<compile_context>
chip_gen: v5e
topology: v5e:2x2
jax: 0.10.0
libtpu: 0.0.40
codegen_flags: <defaults>
</compile_context>

<pallas_src>
import functools

import jax
import jax.numpy as jnp
from jax.experimental import pallas as pl
from jax.experimental.pallas import tpu as pltpu

# ---- model dimensions (from the PyTorch module) ----
N_INPUT = 30          # SelectKBest(k=30)
PAD_INPUT = 128       # zero-padded feature dim (full lane tile)
HIDDEN = [256, 512, 256, 128, 64, 32]
N_OUTPUT = 1
BN_EPS = 1e-5

_PADDED_DIMS = [PAD_INPUT] + HIDDEN + [N_OUTPUT]
_FLOPS_PER_ROW = sum(2 * a * b for a, b in zip(_PADDED_DIMS[:-1], _PADDED_DIMS[1:]))


def _round_up(n, m):
    return ((n + m - 1) // m) * m


def ann_kernel(x_ref,
               w1, b1, s1, t1,
               w2, b2, s2, t2,
               w3, b3, s3, t3,
               w4, b4, s4, t4,
               w5, b5, s5, t5,
               w6, b6, s6, t6,
               w7, b7,
               o_ref):
    """One batch tile: 6 bf16 MXU matmuls + f32 epilogue + VPU final layer."""
    h = x_ref[...]                                   # f32 (TILE_M, 128)

    def block(h, w_ref, b_ref, s_ref, t_ref):
        # bf16 inputs, f32 accumulation on the MXU.
        z = jnp.dot(h.astype(jnp.bfloat16), w_ref[...],
                    preferred_element_type=jnp.float32) + b_ref[...]
        z = jnp.maximum(z, 0.0)                      # ReLU (f32, VPU)
        return z * s_ref[...] + t_ref[...]           # folded BatchNorm1d (eval)

    h = block(h, w1, b1, s1, t1)
    h = block(h, w2, b2, s2, t2)
    h = block(h, w3, b3, s3, t3)
    h = block(h, w4, b4, s4, t4)
    h = block(h, w5, b5, s5, t5)
    h = block(h, w6, b6, s6, t6)

    # dropout: identity in eval mode.
    # Final layer has N=1: keep it off the MXU -> elementwise mul + lane reduce.
    logits = jnp.sum(h * w7[...], axis=-1, keepdims=True) + b7[...]
    o_ref[...] = jax.nn.sigmoid(logits)              # (TILE_M, 1)


def _prep_kernel_params(params):
    """Pad W1 rows to PAD_INPUT, cast hidden weights to bf16, reshape final layer."""
    out = []
    idx = 0
    for layer in range(6):
        w, b, s, t = params[idx:idx + 4]
        idx += 4
        if layer == 0:
            w = jnp.pad(w, ((0, PAD_INPUT - w.shape[0]), (0, 0)))
        out.extend([w.astype(jnp.bfloat16),
                    b.astype(jnp.float32),
                    s.astype(jnp.float32),
                    t.astype(jnp.float32)])
    w, b = params[idx:idx + 2]
    out.extend([w.reshape(1, -1).astype(jnp.float32),   # (1, 32) for the VPU path
                b.reshape(1, 1).astype(jnp.float32)])
    return tuple(out)


@functools.partial(jax.jit, static_argnames=("block_m",))
def ann_forward(x, params, block_m=512):
    """Forward pass. `params` is the flat tuple produced by init_params."""
    batch = x.shape[0]
    kparams = _prep_kernel_params(params)

    # Batch tiling: multiple of 8 (f32 sublane), capped at block_m.
    tile_m = min(block_m, _round_up(batch, 8))
    b_pad = _round_up(batch, tile_m)

    x_p = jnp.pad(x.astype(jnp.float32),
                  ((0, b_pad - batch), (0, PAD_INPUT - x.shape[1])))

    grid = (b_pad // tile_m,)
    x_spec = pl.BlockSpec((tile_m, PAD_INPUT), lambda i: (i, 0))
    # NOTE: output last dim stays 1 (= full array dim); output volume is tiny so the
    # lane-dense rewrite was skipped as not worth the in-kernel sublane->lane reshape.
    o_spec = pl.BlockSpec((tile_m, N_OUTPUT), lambda i: (i, 0))
    # Weights/biases/BN: full-extent blocks, constant index -> resident across steps.
    param_specs = [pl.BlockSpec(p.shape, lambda i: (0, 0)) for p in kparams]

    cost = pl.CostEstimate(
        flops=int(b_pad * _FLOPS_PER_ROW),
        transcendentals=int(b_pad),                          # sigmoid exp per row
        bytes_accessed=int(x_p.size * 4 + b_pad * N_OUTPUT * 4
                           + sum(int(p.size) * p.dtype.itemsize for p in kparams)),
    )

    out = pl.pallas_call(
        ann_kernel,
        out_shape=jax.ShapeDtypeStruct((b_pad, N_OUTPUT), jnp.float32),
        grid=grid,
        in_specs=[x_spec] + param_specs,
        out_specs=o_spec,
        compiler_params=pltpu.CompilerParams(
            dimension_semantics=("parallel",),
            vmem_limit_bytes=32 << 20,
        ),
        cost_estimate=cost,
    )(x_p, *kparams)
    return out[:batch]


def init_params(key):
    """Deterministic synthetic parameters with the shapes implied by ANN.__init__."""
    dims = [N_INPUT] + HIDDEN + [N_OUTPUT]
    params = []
    ks = jax.random.split(key, 64)
    ki = iter(range(64))

    def folded_bn(h, k_gamma, k_beta, k_mean, k_var):
        gamma = 1.0 + 0.1 * jax.random.normal(k_gamma, (h,), jnp.float32)
        beta = 0.1 * jax.random.normal(k_beta, (h,), jnp.float32)
        running_mean = 0.1 * jax.random.normal(k_mean, (h,), jnp.float32)
        running_var = jnp.abs(1.0 + 0.1 * jax.random.normal(k_var, (h,), jnp.float32))
        scale = gamma / jnp.sqrt(running_var + BN_EPS)
        shift = beta - running_mean * scale
        return scale.reshape(1, h), shift.reshape(1, h)

    for layer in range(7):
        fan_in, fan_out = dims[layer], dims[layer + 1]
        bound = 1.0 / jnp.sqrt(fan_in)
        # weight stored as [in, out] (transpose of torch's [out, in])
        w = jax.random.uniform(ks[next(ki)], (fan_in, fan_out), jnp.float32,
                               minval=-bound, maxval=bound)
        b = jax.random.uniform(ks[next(ki)], (1, fan_out), jnp.float32,
                               minval=-bound, maxval=bound)
        if layer < 6:
            s, t = folded_bn(fan_out, ks[next(ki)], ks[next(ki)],
                             ks[next(ki)], ks[next(ki)])
            params.extend([w, b, s, t])
        else:
            params.extend([w, b])
    return tuple(params)


def ann_reference(x, params):
    """Pure-JAX f32 reference for correctness checking."""
    h = x
    idx = 0
    for _ in range(6):
        w, b, s, t = params[idx:idx + 4]
        idx += 4
        h = jnp.maximum(h @ w + b, 0.0)
        h = h * s + t
    w, b = params[idx:idx + 2]
    return jax.nn.sigmoid(h @ w + b)


if __name__ == "__main__":
    key = jax.random.PRNGKey(0)
    k_x, k_p = jax.random.split(key)

    # Small test that still exercises the grid (3 tiles) and batch padding.
    batch = 19
    x = jax.random.normal(k_x, (batch, N_INPUT), jnp.float32)
    params = init_params(k_p)

    out = ann_forward(x, params, block_m=8)
    out = jax.block_until_ready(out)

    ref = ann_reference(x, params)
    assert out.shape == (batch, N_OUTPUT), out.shape
    max_err = float(jnp.max(jnp.abs(out - ref)))
    # bf16 matmul inputs (f32 accumulation) -> loosened tolerance vs the f32 reference.
    assert max_err < 2e-2, f"max abs err = {max_err}"

    print("KERNEL_OK")
</pallas_src>

<mosaic_0001>
module attributes {stable_mosaic.version = 11 : i64} {
  func.func @ann_kernel(%arg0: i32, %arg1: memref<8x128xf32, #tpu.memory_space<vmem>>, %arg2: memref<128x256xbf16, #tpu.memory_space<vmem>>, %arg3: memref<1x256xf32, #tpu.memory_space<vmem>>, %arg4: memref<1x256xf32, #tpu.memory_space<vmem>>, %arg5: memref<1x256xf32, #tpu.memory_space<vmem>>, %arg6: memref<256x512xbf16, #tpu.memory_space<vmem>>, %arg7: memref<1x512xf32, #tpu.memory_space<vmem>>, %arg8: memref<1x512xf32, #tpu.memory_space<vmem>>, %arg9: memref<1x512xf32, #tpu.memory_space<vmem>>, %arg10: memref<512x256xbf16, #tpu.memory_space<vmem>>, %arg11: memref<1x256xf32, #tpu.memory_space<vmem>>, %arg12: memref<1x256xf32, #tpu.memory_space<vmem>>, %arg13: memref<1x256xf32, #tpu.memory_space<vmem>>, %arg14: memref<256x128xbf16, #tpu.memory_space<vmem>>, %arg15: memref<1x128xf32, #tpu.memory_space<vmem>>, %arg16: memref<1x128xf32, #tpu.memory_space<vmem>>, %arg17: memref<1x128xf32, #tpu.memory_space<vmem>>, %arg18: memref<128x64xbf16, #tpu.memory_space<vmem>>, %arg19: memref<1x64xf32, #tpu.memory_space<vmem>>, %arg20: memref<1x64xf32, #tpu.memory_space<vmem>>, %arg21: memref<1x64xf32, #tpu.memory_space<vmem>>, %arg22: memref<64x32xbf16, #tpu.memory_space<vmem>>, %arg23: memref<1x32xf32, #tpu.memory_space<vmem>>, %arg24: memref<1x32xf32, #tpu.memory_space<vmem>>, %arg25: memref<1x32xf32, #tpu.memory_space<vmem>>, %arg26: memref<1x32xf32, #tpu.memory_space<vmem>>, %arg27: memref<1x1xf32, #tpu.memory_space<vmem>>, %arg28: memref<8x1xf32, #tpu.memory_space<vmem>>) attributes {dimension_semantics = [#tpu.dimension_semantics<parallel>], iteration_bounds = array<i64: 3>, scalar_prefetch = 0 : i64, scratch_operands = 0 : i64, tpu.core_type = #tpu.core_type<tc>, window_params = [{transform_indices = @transform_0, window_bounds = array<i64: 8, 128>}, {pipeline_mode = #tpu.pipeline_mode<synchronous>, transform_indices = @transform_1, window_bounds = array<i64: 128, 256>}, {pipeline_mode = #tpu.pipeline_mode<synchronous>, transform_indices = @transform_2, window_bounds = array<i64: 1, 256>}, {pipeline_mode = #tpu.pipeline_mode<synchronous>, transform_indices = @transform_3, window_bounds = array<i64: 1, 256>}, {pipeline_mode = #tpu.pipeline_mode<synchronous>, transform_indices = @transform_4, window_bounds = array<i64: 1, 256>}, {pipeline_mode = #tpu.pipeline_mode<synchronous>, transform_indices = @transform_5, window_bounds = array<i64: 256, 512>}, {pipeline_mode = #tpu.pipeline_mode<synchronous>, transform_indices = @transform_6, window_bounds = array<i64: 1, 512>}, {pipeline_mode = #tpu.pipeline_mode<synchronous>, transform_indices = @transform_7, window_bounds = array<i64: 1, 512>}, {pipeline_mode = #tpu.pipeline_mode<synchronous>, transform_indices = @transform_8, window_bounds = array<i64: 1, 512>}, {pipeline_mode = #tpu.pipeline_mode<synchronous>, transform_indices = @transform_9, window_bounds = array<i64: 512, 256>}, {pipeline_mode = #tpu.pipeline_mode<synchronous>, transform_indices = @transform_10, window_bounds = array<i64: 1, 256>}, {pipeline_mode = #tpu.pipeline_mode<synchronous>, transform_indices = @transform_11, window_bounds = array<i64: 1, 256>}, {pipeline_mode = #tpu.pipeline_mode<synchronous>, transform_indices = @transform_12, window_bounds = array<i64: 1, 256>}, {pipeline_mode = #tpu.pipeline_mode<synchronous>, transform_indices = @transform_13, window_bounds = array<i64: 256, 128>}, {pipeline_mode = #tpu.pipeline_mode<synchronous>, transform_indices = @transform_14, window_bounds = array<i64: 1, 128>}, {pipeline_mode = #tpu.pipeline_mode<synchronous>, transform_indices = @transform_15, window_bounds = array<i64: 1, 128>}, {pipeline_mode = #tpu.pipeline_mode<synchronous>, transform_indices = @transform_16, window_bounds = array<i64: 1, 128>}, {pipeline_mode = #tpu.pipeline_mode<synchronous>, transform_indices = @transform_17, window_bounds = array<i64: 128, 64>}, {pipeline_mode = #tpu.pipeline_mode<synchronous>, transform_indices = @transform_18, window_bounds = array<i64: 1, 64>}, {pipeline_mode = #tpu.pipeline_mode<synchronous>, transform_indices = @transform_19, window_bounds = array<i64: 1, 64>}, {pipeline_mode = #tpu.pipeline_mode<synchronous>, transform_indices = @transform_20, window_bounds = array<i64: 1, 64>}, {pipeline_mode = #tpu.pipeline_mode<synchronous>, transform_indices = @transform_21, window_bounds = array<i64: 64, 32>}, {pipeline_mode = #tpu.pipeline_mode<synchronous>, transform_indices = @transform_22, window_bounds = array<i64: 1, 32>}, {pipeline_mode = #tpu.pipeline_mode<synchronous>, transform_indices = @transform_23, window_bounds = array<i64: 1, 32>}, {pipeline_mode = #tpu.pipeline_mode<synchronous>, transform_indices = @transform_24, window_bounds = array<i64: 1, 32>}, {pipeline_mode = #tpu.pipeline_mode<synchronous>, transform_indices = @transform_25, window_bounds = array<i64: 1, 32>}, {pipeline_mode = #tpu.pipeline_mode<synchronous>, transform_indices = @transform_26, window_bounds = array<i64: 1, 1>}, {transform_indices = @transform_27, window_bounds = array<i64: 8, 1>}]} {
    %c0 = arith.constant 0 : index
    %c0_0 = arith.constant 0 : index
    %0 = vector.load %arg1[%c0, %c0_0] : memref<8x128xf32, #tpu.memory_space<vmem>>, vector<8x128xf32>
    %1 = arith.truncf %0 : vector<8x128xf32> to vector<8x128xbf16>
    %c0_1 = arith.constant 0 : index
    %c0_2 = arith.constant 0 : index
    %2 = vector.load %arg2[%c0_1, %c0_2] : memref<128x256xbf16, #tpu.memory_space<vmem>>, vector<128x256xbf16>
    %cst = arith.constant dense<0.000000e+00> : vector<8x256xf32>
    %3 = tpu.matmul %1, %2, %cst {dimension_numbers = #tpu.dot_dimension_numbers<[1], [0], [0], [1], [0, 0, 1, 1], [], []>} : vector<8x128xbf16>, vector<128x256xbf16>, vector<8x256xf32> -> vector<8x256xf32>
    %c0_3 = arith.constant 0 : index
    %c0_4 = arith.constant 0 : index
    %4 = vector.load %arg3[%c0_3, %c0_4] : memref<1x256xf32, #tpu.memory_space<vmem>>, vector<1x256xf32>
    %5 = vector.broadcast %4 : vector<1x256xf32> to vector<8x256xf32>
    %6 = arith.addf %3, %5 : vector<8x256xf32>
    %cst_5 = arith.constant 0.000000e+00 : f32
    %7 = vector.broadcast %cst_5 : f32 to vector<8x256xf32>
    %8 = arith.maximumf %6, %7 : vector<8x256xf32>
    %c0_6 = arith.constant 0 : index
    %c0_7 = arith.constant 0 : index
    %9 = vector.load %arg4[%c0_6, %c0_7] : memref<1x256xf32, #tpu.memory_space<vmem>>, vector<1x256xf32>
    %10 = vector.broadcast %9 : vector<1x256xf32> to vector<8x256xf32>
    %11 = arith.mulf %8, %10 : vector<8x256xf32>
    %c0_8 = arith.constant 0 : index
    %c0_9 = arith.constant 0 : index
    %12 = vector.load %arg5[%c0_8, %c0_9] : memref<1x256xf32, #tpu.memory_space<vmem>>, vector<1x256xf32>
    %13 = vector.broadcast %12 : vector<1x256xf32> to vector<8x256xf32>
    %14 = arith.addf %11, %13 : vector<8x256xf32>
    %15 = arith.truncf %14 : vector<8x256xf32> to vector<8x256xbf16>
    %c0_10 = arith.constant 0 : index
    %c0_11 = arith.constant 0 : index
    %16 = vector.load %arg6[%c0_10, %c0_11] : memref<256x512xbf16, #tpu.memory_space<vmem>>, vector<256x512xbf16>
    %cst_12 = arith.constant dense<0.000000e+00> : vector<8x512xf32>
    %17 = tpu.matmul %15, %16, %cst_12 {dimension_numbers = #tpu.dot_dimension_numbers<[1], [0], [0], [1], [0, 0, 1, 1], [], []>} : vector<8x256xbf16>, vector<256x512xbf16>, vector<8x512xf32> -> vector<8x512xf32>
    %c0_13 = arith.constant 0 : index
    %c0_14 = arith.constant 0 : index
    %18 = vector.load %arg7[%c0_13, %c0_14] : memref<1x512xf32, #tpu.memory_space<vmem>>, vector<1x512xf32>
    %19 = vector.broadcast %18 : vector<1x512xf32> to vector<8x512xf32>
    %20 = arith.addf %17, %19 : vector<8x512xf32>
    %cst_15 = arith.constant 0.000000e+00 : f32
    %21 = vector.broadcast %cst_15 : f32 to vector<8x512xf32>
    %22 = arith.maximumf %20, %21 : vector<8x512xf32>
    %c0_16 = arith.constant 0 : index
    %c0_17 = arith.constant 0 : index
    %23 = vector.load %arg8[%c0_16, %c0_17] : memref<1x512xf32, #tpu.memory_space<vmem>>, vector<1x512xf32>
    %24 = vector.broadcast %23 : vector<1x512xf32> to vector<8x512xf32>
    %25 = arith.mulf %22, %24 : vector<8x512xf32>
    %c0_18 = arith.constant 0 : index
    %c0_19 = arith.constant 0 : index
    %26 = vector.load %arg9[%c0_18, %c0_19] : memref<1x512xf32, #tpu.memory_space<vmem>>, vector<1x512xf32>
    %27 = vector.broadcast %26 : vector<1x512xf32> to vector<8x512xf32>
    %28 = arith.addf %25, %27 : vector<8x512xf32>
    %29 = arith.truncf %28 : vector<8x512xf32> to vector<8x512xbf16>
    %c0_20 = arith.constant 0 : index
    %c0_21 = arith.constant 0 : index
    %30 = vector.load %arg10[%c0_20, %c0_21] : memref<512x256xbf16, #tpu.memory_space<vmem>>, vector<512x256xbf16>
    %cst_22 = arith.constant dense<0.000000e+00> : vector<8x256xf32>
    %31 = tpu.matmul %29, %30, %cst_22 {dimension_numbers = #tpu.dot_dimension_numbers<[1], [0], [0], [1], [0, 0, 1, 1], [], []>} : vector<8x512xbf16>, vector<512x256xbf16>, vector<8x256xf32> -> vector<8x256xf32>
    %c0_23 = arith.constant 0 : index
    %c0_24 = arith.constant 0 : index
    %32 = vector.load %arg11[%c0_23, %c0_24] : memref<1x256xf32, #tpu.memory_space<vmem>>, vector<1x256xf32>
    %33 = vector.broadcast %32 : vector<1x256xf32> to vector<8x256xf32>
    %34 = arith.addf %31, %33 : vector<8x256xf32>
    %cst_25 = arith.constant 0.000000e+00 : f32
    %35 = vector.broadcast %cst_25 : f32 to vector<8x256xf32>
    %36 = arith.maximumf %34, %35 : vector<8x256xf32>
    %c0_26 = arith.constant 0 : index
    %c0_27 = arith.constant 0 : index
    %37 = vector.load %arg12[%c0_26, %c0_27] : memref<1x256xf32, #tpu.memory_space<vmem>>, vector<1x256xf32>
    %38 = vector.broadcast %37 : vector<1x256xf32> to vector<8x256xf32>
    %39 = arith.mulf %36, %38 : vector<8x256xf32>
    %c0_28 = arith.constant 0 : index
    %c0_29 = arith.constant 0 : index
    %40 = vector.load %arg13[%c0_28, %c0_29] : memref<1x256xf32, #tpu.memory_space<vmem>>, vector<1x256xf32>
    %41 = vector.broadcast %40 : vector<1x256xf32> to vector<8x256xf32>
    %42 = arith.addf %39, %41 : vector<8x256xf32>
    %43 = arith.truncf %42 : vector<8x256xf32> to vector<8x256xbf16>
    %c0_30 = arith.constant 0 : index
    %c0_31 = arith.constant 0 : index
    %44 = vector.load %arg14[%c0_30, %c0_31] : memref<256x128xbf16, #tpu.memory_space<vmem>>, vector<256x128xbf16>
    %cst_32 = arith.constant dense<0.000000e+00> : vector<8x128xf32>
    %45 = tpu.matmul %43, %44, %cst_32 {dimension_numbers = #tpu.dot_dimension_numbers<[1], [0], [0], [1], [0, 0, 1, 1], [], []>} : vector<8x256xbf16>, vector<256x128xbf16>, vector<8x128xf32> -> vector<8x128xf32>
    %c0_33 = arith.constant 0 : index
    %c0_34 = arith.constant 0 : index
    %46 = vector.load %arg15[%c0_33, %c0_34] : memref<1x128xf32, #tpu.memory_space<vmem>>, vector<1x128xf32>
    %47 = vector.broadcast %46 : vector<1x128xf32> to vector<8x128xf32>
    %48 = arith.addf %45, %47 : vector<8x128xf32>
    %cst_35 = arith.constant 0.000000e+00 : f32
    %49 = vector.broadcast %cst_35 : f32 to vector<8x128xf32>
    %50 = arith.maximumf %48, %49 : vector<8x128xf32>
    %c0_36 = arith.constant 0 : index
    %c0_37 = arith.constant 0 : index
    %51 = vector.load %arg16[%c0_36, %c0_37] : memref<1x128xf32, #tpu.memory_space<vmem>>, vector<1x128xf32>
    %52 = vector.broadcast %51 : vector<1x128xf32> to vector<8x128xf32>
    %53 = arith.mulf %50, %52 : vector<8x128xf32>
    %c0_38 = arith.constant 0 : index
    %c0_39 = arith.constant 0 : index
    %54 = vector.load %arg17[%c0_38, %c0_39] : memref<1x128xf32, #tpu.memory_space<vmem>>, vector<1x128xf32>
    %55 = vector.broadcast %54 : vector<1x128xf32> to vector<8x128xf32>
    %56 = arith.addf %53, %55 : vector<8x128xf32>
    %57 = arith.truncf %56 : vector<8x128xf32> to vector<8x128xbf16>
    %c0_40 = arith.constant 0 : index
    %c0_41 = arith.constant 0 : index
    %58 = vector.load %arg18[%c0_40, %c0_41] : memref<128x64xbf16, #tpu.memory_space<vmem>>, vector<128x64xbf16>
    %cst_42 = arith.constant dense<0.000000e+00> : vector<8x64xf32>
    %59 = tpu.matmul %57, %58, %cst_42 {dimension_numbers = #tpu.dot_dimension_numbers<[1], [0], [0], [1], [0, 0, 1, 1], [], []>} : vector<8x128xbf16>, vector<128x64xbf16>, vector<8x64xf32> -> vector<8x64xf32>
    %c0_43 = arith.constant 0 : index
    %c0_44 = arith.constant 0 : index
    %60 = vector.load %arg19[%c0_43, %c0_44] : memref<1x64xf32, #tpu.memory_space<vmem>>, vector<1x64xf32>
    %61 = vector.broadcast %60 : vector<1x64xf32> to vector<8x64xf32>
    %62 = arith.addf %59, %61 : vector<8x64xf32>
    %cst_45 = arith.constant 0.000000e+00 : f32
    %63 = vector.broadcast %cst_45 : f32 to vector<8x64xf32>
    %64 = arith.maximumf %62, %63 : vector<8x64xf32>
    %c0_46 = arith.constant 0 : index
    %c0_47 = arith.constant 0 : index
    %65 = vector.load %arg20[%c0_46, %c0_47] : memref<1x64xf32, #tpu.memory_space<vmem>>, vector<1x64xf32>
    %66 = vector.broadcast %65 : vector<1x64xf32> to vector<8x64xf32>
    %67 = arith.mulf %64, %66 : vector<8x64xf32>
    %c0_48 = arith.constant 0 : index
    %c0_49 = arith.constant 0 : index
    %68 = vector.load %arg21[%c0_48, %c0_49] : memref<1x64xf32, #tpu.memory_space<vmem>>, vector<1x64xf32>
    %69 = vector.broadcast %68 : vector<1x64xf32> to vector<8x64xf32>
    %70 = arith.addf %67, %69 : vector<8x64xf32>
    %71 = arith.truncf %70 : vector<8x64xf32> to vector<8x64xbf16>
    %c0_50 = arith.constant 0 : index
    %c0_51 = arith.constant 0 : index
    %72 = vector.load %arg22[%c0_50, %c0_51] : memref<64x32xbf16, #tpu.memory_space<vmem>>, vector<64x32xbf16>
    %cst_52 = arith.constant dense<0.000000e+00> : vector<8x32xf32>
    %73 = tpu.matmul %71, %72, %cst_52 {dimension_numbers = #tpu.dot_dimension_numbers<[1], [0], [0], [1], [0, 0, 1, 1], [], []>} : vector<8x64xbf16>, vector<64x32xbf16>, vector<8x32xf32> -> vector<8x32xf32>
    %c0_53 = arith.constant 0 : index
    %c0_54 = arith.constant 0 : index
    %74 = vector.load %arg23[%c0_53, %c0_54] : memref<1x32xf32, #tpu.memory_space<vmem>>, vector<1x32xf32>
    %75 = vector.broadcast %74 : vector<1x32xf32> to vector<8x32xf32>
    %76 = arith.addf %73, %75 : vector<8x32xf32>
    %cst_55 = arith.constant 0.000000e+00 : f32
    %77 = vector.broadcast %cst_55 : f32 to vector<8x32xf32>
    %78 = arith.maximumf %76, %77 : vector<8x32xf32>
    %c0_56 = arith.constant 0 : index
    %c0_57 = arith.constant 0 : index
    %79 = vector.load %arg24[%c0_56, %c0_57] : memref<1x32xf32, #tpu.memory_space<vmem>>, vector<1x32xf32>
    %80 = vector.broadcast %79 : vector<1x32xf32> to vector<8x32xf32>
    %81 = arith.mulf %78, %80 : vector<8x32xf32>
    %c0_58 = arith.constant 0 : index
    %c0_59 = arith.constant 0 : index
    %82 = vector.load %arg25[%c0_58, %c0_59] : memref<1x32xf32, #tpu.memory_space<vmem>>, vector<1x32xf32>
    %83 = vector.broadcast %82 : vector<1x32xf32> to vector<8x32xf32>
    %84 = arith.addf %81, %83 : vector<8x32xf32>
    %c0_60 = arith.constant 0 : index
    %c0_61 = arith.constant 0 : index
    %85 = vector.load %arg26[%c0_60, %c0_61] : memref<1x32xf32, #tpu.memory_space<vmem>>, vector<1x32xf32>
    %86 = vector.broadcast %85 : vector<1x32xf32> to vector<8x32xf32>
    %87 = arith.mulf %84, %86 : vector<8x32xf32>
    %cst_62 = arith.constant dense<0.000000e+00> : vector<8xf32>
    %88 = vector.multi_reduction <add>, %87, %cst_62 [1] : vector<8x32xf32> to vector<8xf32>
    %89 = vector.shape_cast %88 : vector<8xf32> to vector<8x1xf32>
    %c0_63 = arith.constant 0 : index
    %c0_64 = arith.constant 0 : index
    %90 = vector.load %arg27[%c0_63, %c0_64] : memref<1x1xf32, #tpu.memory_space<vmem>>, vector<1x1xf32>
    %91 = vector.broadcast %90 : vector<1x1xf32> to vector<8x1xf32>
    %92 = arith.addf %89, %91 : vector<8x1xf32>
    %93 = arith.negf %92 : vector<8x1xf32>
    %94 = math.exp %93 : vector<8x1xf32>
    %cst_65 = arith.constant 1.000000e+00 : f32
    %95 = vector.broadcast %cst_65 : f32 to vector<8x1xf32>
    %96 = arith.addf %95, %94 : vector<8x1xf32>
    %97 = arith.divf %95, %96 : vector<8x1xf32>
    %c0_66 = arith.constant 0 : index
    %c0_67 = arith.constant 0 : index
    %98 = vector.load %arg28[%c0_66, %c0_67] : memref<8x1xf32, #tpu.memory_space<vmem>>, vector<8x1xf32>
    tpu.vector_store %arg28[%c0_66, %c0_67], %97 {strides = array<i32>} : memref<8x1xf32, #tpu.memory_space<vmem>>, vector<8x1xf32>,
    return
  }
  func.func @transform_0(%arg0: i32) -> (i32, i32) {
    %c0_i32 = arith.constant 0 : i32
    %c0_i32_0 = arith.constant 0 : i32
    return %arg0, %c0_i32 : i32, i32
  }
  func.func @transform_1(%arg0: i32) -> (i32, i32) {
    %c0_i32 = arith.constant 0 : i32
    %c0_i32_0 = arith.constant 0 : i32
    %c0_i32_1 = arith.constant 0 : i32
    return %c0_i32, %c0_i32_0 : i32, i32
  }
  func.func @transform_2(%arg0: i32) -> (i32, i32) {
    %c0_i32 = arith.constant 0 : i32
    %c0_i32_0 = arith.constant 0 : i32
    %c0_i32_1 = arith.constant 0 : i32
    return %c0_i32, %c0_i32_0 : i32, i32
  }
  func.func @transform_3(%arg0: i32) -> (i32, i32) {
    %c0_i32 = arith.constant 0 : i32
    %c0_i32_0 = arith.constant 0 : i32
    %c0_i32_1 = arith.constant 0 : i32
    return %c0_i32, %c0_i32_0 : i32, i32
  }
  func.func @transform_4(%arg0: i32) -> (i32, i32) {
    %c0_i32 = arith.constant 0 : i32
    %c0_i32_0 = arith.constant 0 : i32
    %c0_i32_1 = arith.constant 0 : i32
    return %c0_i32, %c0_i32_0 : i32, i32
  }
  func.func @transform_5(%arg0: i32) -> (i32, i32) {
    %c0_i32 = arith.constant 0 : i32
    %c0_i32_0 = arith.constant 0 : i32
    %c0_i32_1 = arith.constant 0 : i32
    return %c0_i32, %c0_i32_0 : i32, i32
  }
  func.func @transform_6(%arg0: i32) -> (i32, i32) {
    %c0_i32 = arith.constant 0 : i32
    %c0_i32_0 = arith.constant 0 : i32
    %c0_i32_1 = arith.constant 0 : i32
    return %c0_i32, %c0_i32_0 : i32, i32
  }
  func.func @transform_7(%arg0: i32) -> (i32, i32) {
    %c0_i32 = arith.constant 0 : i32
    %c0_i32_0 = arith.constant 0 : i32
    %c0_i32_1 = arith.constant 0 : i32
    return %c0_i32, %c0_i32_0 : i32, i32
  }
  func.func @transform_8(%arg0: i32) -> (i32, i32) {
    %c0_i32 = arith.constant 0 : i32
    %c0_i32_0 = arith.constant 0 : i32
    %c0_i32_1 = arith.constant 0 : i32
    return %c0_i32, %c0_i32_0 : i32, i32
  }
  func.func @transform_9(%arg0: i32) -> (i32, i32) {
    %c0_i32 = arith.constant 0 : i32
    %c0_i32_0 = arith.constant 0 : i32
    %c0_i32_1 = arith.constant 0 : i32
    return %c0_i32, %c0_i32_0 : i32, i32
  }
  func.func @transform_10(%arg0: i32) -> (i32, i32) {
    %c0_i32 = arith.constant 0 : i32
    %c0_i32_0 = arith.constant 0 : i32
    %c0_i32_1 = arith.constant 0 : i32
    return %c0_i32, %c0_i32_0 : i32, i32
  }
  func.func @transform_11(%arg0: i32) -> (i32, i32) {
    %c0_i32 = arith.constant 0 : i32
    %c0_i32_0 = arith.constant 0 : i32
    %c0_i32_1 = arith.constant 0 : i32
    return %c0_i32, %c0_i32_0 : i32, i32
  }
  func.func @transform_12(%arg0: i32) -> (i32, i32) {
    %c0_i32 = arith.constant 0 : i32
    %c0_i32_0 = arith.constant 0 : i32
    %c0_i32_1 = arith.constant 0 : i32
    return %c0_i32, %c0_i32_0 : i32, i32
  }
  func.func @transform_13(%arg0: i32) -> (i32, i32) {
    %c0_i32 = arith.constant 0 : i32
    %c0_i32_0 = arith.constant 0 : i32
    %c0_i32_1 = arith.constant 0 : i32
    return %c0_i32, %c0_i32_0 : i32, i32
  }
  func.func @transform_14(%arg0: i32) -> (i32, i32) {
    %c0_i32 = arith.constant 0 : i32
    %c0_i32_0 = arith.constant 0 : i32
    %c0_i32_1 = arith.constant 0 : i32
    return %c0_i32, %c0_i32_0 : i32, i32
  }
  func.func @transform_15(%arg0: i32) -> (i32, i32) {
    %c0_i32 = arith.constant 0 : i32
    %c0_i32_0 = arith.constant 0 : i32
    %c0_i32_1 = arith.constant 0 : i32
    return %c0_i32, %c0_i32_0 : i32, i32
  }
  func.func @transform_16(%arg0: i32) -> (i32, i32) {
    %c0_i32 = arith.constant 0 : i32
    %c0_i32_0 = arith.constant 0 : i32
    %c0_i32_1 = arith.constant 0 : i32
    return %c0_i32, %c0_i32_0 : i32, i32
  }
  func.func @transform_17(%arg0: i32) -> (i32, i32) {
    %c0_i32 = arith.constant 0 : i32
    %c0_i32_0 = arith.constant 0 : i32
    %c0_i32_1 = arith.constant 0 : i32
    return %c0_i32, %c0_i32_0 : i32, i32
  }
  func.func @transform_18(%arg0: i32) -> (i32, i32) {
    %c0_i32 = arith.constant 0 : i32
    %c0_i32_0 = arith.constant 0 : i32
    %c0_i32_1 = arith.constant 0 : i32
    return %c0_i32, %c0_i32_0 : i32, i32
  }
  func.func @transform_19(%arg0: i32) -> (i32, i32) {
    %c0_i32 = arith.constant 0 : i32
    %c0_i32_0 = arith.constant 0 : i32
    %c0_i32_1 = arith.constant 0 : i32
    return %c0_i32, %c0_i32_0 : i32, i32
  }
  func.func @transform_20(%arg0: i32) -> (i32, i32) {
    %c0_i32 = arith.constant 0 : i32
    %c0_i32_0 = arith.constant 0 : i32
    %c0_i32_1 = arith.constant 0 : i32
    return %c0_i32, %c0_i32_0 : i32, i32
  }
  func.func @transform_21(%arg0: i32) -> (i32, i32) {
    %c0_i32 = arith.constant 0 : i32
    %c0_i32_0 = arith.constant 0 : i32
    %c0_i32_1 = arith.constant 0 : i32
    return %c0_i32, %c0_i32_0 : i32, i32
  }
  func.func @transform_22(%arg0: i32) -> (i32, i32) {
    %c0_i32 = arith.constant 0 : i32
    %c0_i32_0 = arith.constant 0 : i32
    %c0_i32_1 = arith.constant 0 : i32
    return %c0_i32, %c0_i32_0 : i32, i32
  }
  func.func @transform_23(%arg0: i32) -> (i32, i32) {
    %c0_i32 = arith.constant 0 : i32
    %c0_i32_0 = arith.constant 0 : i32
    %c0_i32_1 = arith.constant 0 : i32
    return %c0_i32, %c0_i32_0 : i32, i32
  }
  func.func @transform_24(%arg0: i32) -> (i32, i32) {
    %c0_i32 = arith.constant 0 : i32
    %c0_i32_0 = arith.constant 0 : i32
    %c0_i32_1 = arith.constant 0 : i32
    return %c0_i32, %c0_i32_0 : i32, i32
  }
  func.func @transform_25(%arg0: i32) -> (i32, i32) {
    %c0_i32 = arith.constant 0 : i32
    %c0_i32_0 = arith.constant 0 : i32
    %c0_i32_1 = arith.constant 0 : i32
    return %c0_i32, %c0_i32_0 : i32, i32
  }
  func.func @transform_26(%arg0: i32) -> (i32, i32) {
    %c0_i32 = arith.constant 0 : i32
    %c0_i32_0 = arith.constant 0 : i32
    %c0_i32_1 = arith.constant 0 : i32
    return %c0_i32, %c0_i32_0 : i32, i32
  }
  func.func @transform_27(%arg0: i32) -> (i32, i32) {
    %c0_i32 = arith.constant 0 : i32
    %c0_i32_0 = arith.constant 0 : i32
    return %arg0, %c0_i32 : i32, i32
  }
}

</mosaic_0001>

<bundles_post_ra>
// kernel: ann_forward.1
= control target key start
LH: loop header
LB: loop body
LE: loop exit
PB: predicated region body
PF: predicated region fallthrough
CT: control target
= control target key end

     0   :  { %s4544_s0 = inlined_call_operand.vmem [shape: f32[24,128], index: 0, kind: input, shape index: {}]   ;;  %s4545_s1 = inlined_call_operand.vmem [shape: bf16[128,256], index: 1, kind: input, shape index: {}]   ;;  %s4546_s2 = inlined_call_operand.vmem [shape: f32[1,256], index: 2, kind: input, shape index: {}]   ;;  %s4547_s3 = inlined_call_operand.vmem [shape: f32[1,256], index: 3, kind: input, shape index: {}]   ;;  %s4548_s4 = inlined_call_operand.vmem [shape: f32[1,256], index: 4, kind: input, shape index: {}]   ;;  %s4549_s5 = inlined_call_operand.vmem [shape: bf16[256,512], index: 5, kind: input, shape index: {}]   ;;  %s4550_s6 = inlined_call_operand.vmem [shape: f32[1,512], index: 6, kind: input, shape index: {}]   ;;  %s4551_s7 = inlined_call_operand.vmem [shape: f32[1,512], index: 7, kind: input, shape index: {}]   ;;  %s4552_s8 = inlined_call_operand.vmem [shape: f32[1,512], index: 8, kind: input, shape index: {}]   ;;  %s4553_s9 = inlined_call_operand.vmem [shape: bf16[512,256], index: 9, kind: input, shape index: {}]   ;;  %s4554_s10 = inlined_call_operand.vmem [shape: f32[1,256], index: 10, kind: input, shape index: {}]   ;;  %s4555_s11 = inlined_call_operand.vmem [shape: f32[1,256], index: 11, kind: input, shape index: {}]   ;;  %s4556_s12 = inlined_call_operand.vmem [shape: f32[1,256], index: 12, kind: input, shape index: {}]   ;;  %s4557_s13 = inlined_call_operand.vmem [shape: bf16[256,128], index: 13, kind: input, shape index: {}]   ;;  %s4558_s14 = inlined_call_operand.vmem [shape: f32[1,128], index: 14, kind: input, shape index: {}]   ;;  %s4559_s15 = inlined_call_operand.vmem [shape: f32[1,128], index: 15, kind: input, shape index: {}]   ;;  %s4560_s16 = inlined_call_operand.vmem [shape: f32[1,128], index: 16, kind: input, shape index: {}]   ;;  %s4561_s17 = inlined_call_operand.vmem [shape: bf16[128,64], index: 17, kind: input, shape index: {}]   ;;  %s4562_s18 = inlined_call_operand.vmem [shape: f32[1,64], index: 18, kind: input, shape index: {}]   ;;  %s4563_s19 = inlined_call_operand.vmem [shape: f32[1,64], index: 19, kind: input, shape index: {}]   ;;  %s4564_s20 = inlined_call_operand.vmem [shape: f32[1,64], index: 20, kind: input, shape index: {}]   ;;  %s4565_s21 = inlined_call_operand.vmem [shape: bf16[64,32], index: 21, kind: input, shape index: {}]   ;;  %s4566_s22 = inlined_call_operand.vmem [shape: f32[1,32], index: 22, kind: input, shape index: {}]   ;;  %s4567_s23 = inlined_call_operand.vmem [shape: f32[1,32], index: 23, kind: input, shape index: {}]   ;;  %s4568_s24 = inlined_call_operand.vmem [shape: f32[1,32], index: 24, kind: input, shape index: {}]   ;;  %s4569_s25 = inlined_call_operand.vmem [shape: f32[1,32], index: 25, kind: input, shape index: {}]   ;;  %s4570_s26 = inlined_call_operand.<no memory space> [shape: f32[1,1], index: 26, kind: input, shape index: {}]   ;;  %s4571_s27 = inlined_call_operand.vmem [shape: f32[24,1], index: 27, kind: output, shape index: {}]  }
   0x1   :  { %4577 = sst [smem:[#allocation5_spill]] %s4544_s0  ;;  %v32_v0 = vstv %s4570_s26 }
   0x2   :  { %4578 = sst [smem:[#allocation6_spill]] %s4545_s1  ;;  %33 = vst [vmem:[#allocation2] sm:$0x1] %v32_v0 }
   0x3   :  { %4579 = sst [smem:[#allocation7_spill]] %s4546_s2 }
   0x4   :  { %4580 = sst [smem:[#allocation8_spill]] %s4547_s3 }
   0x5   :  { %4581 = sst [smem:[#allocation9_spill]] %s4548_s4 }
   0x6   :  { %4582 = sst [smem:[#allocation10_spill]] %s4549_s5 }
   0x7   :  { %4583 = sst [smem:[#allocation11_spill]] %s4550_s6 }
   0x8   :  { %4584 = sst [smem:[#allocation12_spill]] %s4551_s7 }
   0x9   :  { %4585 = sst [smem:[#allocation13_spill]] %s4552_s8  ;;  %s3475_s8 = smov 0  }
   0xa   :  { %4586 = sst [smem:[#allocation14_spill]] %s4553_s9 }
   0xb   :  { %4587 = sst [smem:[#allocation15_spill]] %s4554_s10 }
   0xc   :  { %4588 = sst [smem:[#allocation16_spill]] %s4555_s11 }
   0xd   :  { %4589 = sst [smem:[#allocation17_spill]] %s4571_s27 }
   0xe LB: > { %4590 = sst [smem:[#allocation3_spill]] %s3330_s8  ;;  %s2430_s30 = sadd.s32 4294967295, %s3330_s8   ;;  %s3330_s8 = sphi %s3475_s8, %s39_s8  }
   0xf   : > { %p2434_p0 = scmp.ge.s32.totalorder %s3330_s8, 1  ;;  %p738_p1 = scmp.lt.s32.totalorder %s3330_s8, 4 }
  0x11   : > { %p739_p2 = pnand %p2434_p0, %p738_p1 }
  0x13   : > { %742 = sbr.rel (%p739_p2) target bundleno = 1076 (0x434), region = 128 }
  0x18   : > { %s4591_s28 = sld [smem:[#allocation6_spill]]  ;;  %p3557_p3 = scmp.lt.s32.totalorder %s2430_s30, 2  ;;  %vm2314_vm0 = vcmask 523264   ;;  %vm2347_vm1 = vcmask 261120   ;;  %vm2375_vm5 = vcmask 7168  }
  0x19   : > { %s4592_s11 = sld [smem:[#allocation10_spill]] }
  0x1a   : > { %s4609_s30 = smov (!%p3557_p3, %s2430_s30), 2  ;;  %s4595_s1 = sld [smem:[#allocation5_spill]] }
  0x1b   : > { %4594 = sst [smem:[#allocation4_spill]] %s4609_s30  ;;  %s2435_s26 = sshll.u32 %s4609_s30, 3 }
  0x1c   : > { %s4596_s27 = sld [smem:[#allocation7_spill]] }
  0x1d   : > { %s4597_s3 = sld [smem:[#allocation8_spill]] }
  0x1e   : > { %v2495_v1 = vld [vmem:[%s4591_s28 + $0x70] sm:$0xf]  ;;  %v3144_v2 = vld [vmem:[%s4591_s28 + $0x74] sm:$0xf0]  ;;  %v3143_v3 = vld [vmem:[%s4591_s28 + $0x74] sm:$0xf] }
  0x1f   : > { %v2496_v4 = vor.u32 %v3144_v2, %v2495_v1  ;;  %v2497_v5 = vld [vmem:[%s4591_s28 + $0x78] sm:$0xf0]  ;;  %v2487_v6 = vld [vmem:[%s4591_s28 + $0x60] sm:$0xf]  ;;  %v3142_v7 = vld [vmem:[%s4591_s28 + $0x64] sm:$0xf0] }
  0x20   : > { %v2500_v8 = vor.u32 %v3143_v3, %v2497_v5  ;;  %v3141_v9 = vld [vmem:[%s4591_s28 + $0x64] sm:$0xf]  ;;  %v2489_v10 = vld [vmem:[%s4591_s28 + $0x68] sm:$0xf0]  ;;  %v2488_v11 = vor.u32 %v3142_v7, %v2487_v6  ;;  %v2479_v13 = vld [vmem:[%s4591_s28 + $0x50] sm:$0xf]  ;;  %s811_s6 = scalar_lea.vmem %s4595_s1, %s2435_s26 }
  0x21   : > { %921 = vmatpush.bf16.msra.mxu0 %v2496_v4  ;;  %v2492_v12 = vor.u32 %v3141_v9, %v2489_v10  ;;  %v3140_v14 = vld [vmem:[%s4591_s28 + $0x54] sm:$0xf0]  ;;  %v3139_v15 = vld [vmem:[%s4591_s28 + $0x54] sm:$0xf]  ;;  %v2481_v16 = vld [vmem:[%s4591_s28 + $0x58] sm:$0xf0] }
  0x22   : > { %934 = vmatpush.bf16.msra.mxu1 %v2500_v8  ;;  %v2480_v17 = vor.u32 %v3140_v14, %v2479_v13  ;;  %v2484_v18 = vor.u32 %v3139_v15, %v2481_v16  ;;  %v2471_v19 = vld [vmem:[%s4591_s28 + $0x40] sm:$0xf]  ;;  %v3138_v20 = vld [vmem:[%s4591_s28 + $0x44] sm:$0xf0]  ;;  %v3137_v21 = vld [vmem:[%s4591_s28 + $0x44] sm:$0xf] }
  0x23   : > { %v2473_v22 = vld [vmem:[%s4591_s28 + $0x48] sm:$0xf0]  ;;  %v2472_v23 = vor.u32 %v3138_v20, %v2471_v19  ;;  %v2615_v24 = vld [vmem:[%s4592_s11 + $0xe0] sm:$0xf]  ;;  %v3175_v25 = vld [vmem:[%s4592_s11 + $0xec] sm:$0xf0] }
  0x24   : > { %v2743_v26 = vld [vmem:[%s4592_s11 + $0x1e0] sm:$0xf]  ;;  %v2476_v27 = vor.u32 %v3137_v21, %v2473_v22  ;;  %v2463_v28 = vld [vmem:[%s4591_s28 + $0x30] sm:$0xf]  ;;  %v3136_v29 = vld [vmem:[%s4591_s28 + $0x34] sm:$0xf0]  ;;  %v2616_v30 = vor.u32 %v3175_v25, %v2615_v24 }
  0x25   : > { %922 = vmatpush.bf16.msra.mxu0 %v2488_v11  ;;  %v3207_v31 = vld [vmem:[%s4592_s11 + $0x1ec] sm:$0xf0]  ;;  %v3135_v32 = vld [vmem:[%s4591_s28 + $0x34] sm:$0xf]  ;;  %v2465_v33 = vld [vmem:[%s4591_s28 + $0x38] sm:$0xf0]  ;;  %v2464_v37 = vor.u32 %v3136_v29, %v2463_v28 }
  0x26   : > { %935 = vmatpush.bf16.msra.mxu1 %v2492_v12  ;;  %v2744_v34 = vor.u32 %v3207_v31, %v2743_v26  ;;  %1361 = vmatpush.bf16.msra.mxu2 %v2616_v30  ;;  %v2599_v35 = vld [vmem:[%s4592_s11 + $0xc0] sm:$0xf]  ;;  %v3171_v36 = vld [vmem:[%s4592_s11 + $0xcc] sm:$0xf0]  ;;  %v2468_v42 = vor.u32 %v3135_v32, %v2465_v33  ;;  %v3134_v43 = vld [vmem:[%s4591_s28 + $0x24] sm:$0xf0] }
  0x27   : > { %v2455_v38 = vld [vmem:[%s4591_s28 + $0x20] sm:$0xf]  ;;  %v2600_v39 = vor.u32 %v3171_v36, %v2599_v35  ;;  %v3203_v41 = vld [vmem:[%s4592_s11 + $0x1cc] sm:$0xf0]  ;;  %v3133_v44 = vld [vmem:[%s4591_s28 + $0x24] sm:$0xf] }
  0x28   : > { %1374 = vmatpush.bf16.msra.mxu3 %v2744_v34  ;;  %v2727_v40 = vld [vmem:[%s4592_s11 + $0x1c0] sm:$0xf]  ;;  %v2457_v45 = vld [vmem:[%s4591_s28 + $0x28] sm:$0xf0]  ;;  %v3167_v48 = vld [vmem:[%s4592_s11 + $0xac] sm:$0xf0]  ;;  %v2456_v52 = vor.u32 %v3134_v43, %v2455_v38 }
  0x29   : > { %923 = vmatpush.bf16.msra.mxu0 %v2480_v17  ;;  %v2728_v46 = vor.u32 %v3203_v41, %v2727_v40  ;;  %v2583_v47 = vld [vmem:[%s4592_s11 + $0xa0] sm:$0xf]  ;;  %v3199_v51 = vld [vmem:[%s4592_s11 + $0x1ac] sm:$0xf0]  ;;  %v3132_v54 = vld [vmem:[%s4591_s28 + $0x14] sm:$0xf0]  ;;  %v2460_v57 = vor.u32 %v3133_v44, %v2457_v45 }
  0x2a   : > { %936 = vmatpush.bf16.msra.mxu1 %v2484_v18  ;;  %1362 = vmatpush.bf16.msra.mxu2 %v2600_v39  ;;  %v2584_v49 = vor.u32 %v3167_v48, %v2583_v47  ;;  %v2711_v50 = vld [vmem:[%s4592_s11 + $0x1a0] sm:$0xf]  ;;  %v2447_v53 = vld [vmem:[%s4591_s28 + $0x10] sm:$0xf]  ;;  %v3131_v55 = vld [vmem:[%s4591_s28 + $0x14] sm:$0xf] }
  0x2b   : > { %v2712_v56 = vor.u32 %v3199_v51, %v2711_v50  ;;  %v2567_v58 = vld [vmem:[%s4592_s11 + $0x80] sm:$0xf]  ;;  %v3163_v59 = vld [vmem:[%s4592_s11 + $0x8c] sm:$0xf0]  ;;  %v2449_v61 = vld [vmem:[%s4591_s28 + $0x18] sm:$0xf0]  ;;  %v2448_v1 = vor.u32 %v3132_v54, %v2447_v53 }
  0x2c   : > { %1375 = vmatpush.bf16.msra.mxu3 %v2728_v46  ;;  %v2695_v60 = vld [vmem:[%s4592_s11 + $0x180] sm:$0xf]  ;;  %v3195_v62 = vld [vmem:[%s4592_s11 + $0x18c] sm:$0xf0]  ;;  %v2568_v0 = vor.u32 %v3163_v59, %v2567_v58  ;;  %v3130_v2 = vld [vmem:[%s4591_s28 + $0x4] sm:$0xf0]  ;;  %v2452_v6 = vor.u32 %v3131_v55, %v2449_v61 }
  0x2d   : > { %924 = vmatpush.bf16.msra.mxu0 %v2472_v23  ;;  %v2439_v63 = vld [vmem:[%s4591_s28] sm:$0xf]  ;;  %v2696_v3 = vor.u32 %v3195_v62, %v2695_v60  ;;  %v3159_v5 = vld [vmem:[%s4592_s11 + $0x6c] sm:$0xf0]  ;;  %v3129_v7 = vld [vmem:[%s4591_s28 + $0x4] sm:$0xf] }
  0x2e   : > { %937 = vmatpush.bf16.msra.mxu1 %v2476_v27  ;;  %1363 = vmatpush.bf16.msra.mxu2 %v2584_v49  ;;  %v2551_v4 = vld [vmem:[%s4592_s11 + $0x60] sm:$0xf]  ;;  %v3191_v9 = vld [vmem:[%s4592_s11 + $0x16c] sm:$0xf0]  ;;  %v2441_v10 = vld [vmem:[%s4591_s28 + $0x8] sm:$0xf0]  ;;  %v2440_v16 = vor.u32 %v3130_v2, %v2439_v63 }
  0x2f   : > { %v2679_v8 = vld [vmem:[%s4592_s11 + $0x160] sm:$0xf]  ;;  %v3173_v11 = vld [vmem:[%s4592_s11 + $0xe4] sm:$0xf]  ;;  %v2617_v12 = vld [vmem:[%s4592_s11 + $0xf0] sm:$0xf0]  ;;  %v2552_v15 = vor.u32 %v3159_v5, %v2551_v4  ;;  %v2444_v21 = vor.u32 %v3129_v7, %v2441_v10 }
  0x30   : > { %1376 = vmatpush.bf16.msra.mxu3 %v2712_v56  ;;  %v3205_v13 = vld [vmem:[%s4592_s11 + $0x1e4] sm:$0xf]  ;;  %v2745_v14 = vld [vmem:[%s4592_s11 + $0x1f0] sm:$0xf0]  ;;  %v2680_v18 = vor.u32 %v3191_v9, %v2679_v8  ;;  %v2535_v19 = vld [vmem:[%s4592_s11 + $0x40] sm:$0xf]  ;;  %v2620_v22 = vor.u32 %v3173_v11, %v2617_v12 }
  0x31   : > { %925 = vmatpush.bf16.msra.mxu0 %v2464_v37  ;;  %v817_v17 = vld [vmem:[%s811_s6] sm:$0xff]  ;;  %v3155_v20 = vld [vmem:[%s4592_s11 + $0x4c] sm:$0xf0]  ;;  %v2748_v25 = vor.u32 %v3205_v13, %v2745_v14  ;;  %v2601_v27 = vld [vmem:[%s4592_s11 + $0xd0] sm:$0xf0]  ;;  %s4598_s7 = sld [smem:[#allocation9_spill]] }
  0x32   : > { %938 = vmatpush.bf16.msra.mxu1 %v2468_v42  ;;  %1364 = vmatpush.bf16.msra.mxu2 %v2568_v0  ;;  %v2663_v23 = vld [vmem:[%s4592_s11 + $0x140] sm:$0xf]  ;;  %v3187_v24 = vld [vmem:[%s4592_s11 + $0x14c] sm:$0xf0]  ;;  %v3169_v26 = vld [vmem:[%s4592_s11 + $0xc4] sm:$0xf]  ;;  %v818_v28 = vpack.c.bf16 %v817_v17, %v817_v17  ;;  %v2536_v31 = vor.u32 %v3155_v20, %v2535_v19 }
  0x33   : > { %v3201_v29 = vld [vmem:[%s4592_s11 + $0x1c4] sm:$0xf]  ;;  %v2729_v30 = vld [vmem:[%s4592_s11 + $0x1d0] sm:$0xf0]  ;;  %v2664_v32 = vor.u32 %v3187_v24, %v2663_v23  ;;  %v2519_v33 = vld [vmem:[%s4592_s11 + $0x20] sm:$0xf]  ;;  %v2604_v35 = vor.u32 %v3169_v26, %v2601_v27 }
  0x34   : > { %1377 = vmatpush.bf16.msra.mxu3 %v2696_v3  ;;  %v3151_v34 = vld [vmem:[%s4592_s11 + $0x2c] sm:$0xf0]  ;;  %v3165_v36 = vld [vmem:[%s4592_s11 + $0xa4] sm:$0xf]  ;;  %v2647_v37 = vld [vmem:[%s4592_s11 + $0x120] sm:$0xf]  ;;  %v2732_v39 = vor.u32 %v3201_v29, %v2729_v30 }
  0x35   : > { %926 = vmatpush.bf16.msra.mxu0 %v2456_v52  ;;  %v3183_v38 = vld [vmem:[%s4592_s11 + $0x12c] sm:$0xf0]  ;;  %v2585_v40 = vld [vmem:[%s4592_s11 + $0xb0] sm:$0xf0]  ;;  %v3197_v41 = vld [vmem:[%s4592_s11 + $0x1a4] sm:$0xf]  ;;  %v2520_v43 = vor.u32 %v3151_v34, %v2519_v33 }
  0x36   : > { %939 = vmatpush.bf16.msra.mxu1 %v2460_v57  ;;  %1365 = vmatpush.bf16.msra.mxu2 %v2552_v15  ;;  %v2713_v42 = vld [vmem:[%s4592_s11 + $0x1b0] sm:$0xf0]  ;;  %v2503_v44 = vld [vmem:[%s4592_s11] sm:$0xf]  ;;  %v3147_v45 = vld [vmem:[%s4592_s11 + $0xc] sm:$0xf0]  ;;  %v2648_v49 = vor.u32 %v3183_v38, %v2647_v37  ;;  %v2588_v53 = vor.u32 %v3165_v36, %v2585_v40 }
  0x37   : > { %v2631_v46 = vld [vmem:[%s4592_s11 + $0x100] sm:$0xf]  ;;  %v3161_v47 = vld [vmem:[%s4592_s11 + $0x84] sm:$0xf]  ;;  %v2569_v48 = vld [vmem:[%s4592_s11 + $0x90] sm:$0xf0]  ;;  %v2716_v57 = vor.u32 %v3197_v41, %v2713_v42  ;;  %v2504_v59 = vor.u32 %v3147_v45, %v2503_v44 }
  0x38   : > { %1378 = vmatpush.bf16.msra.mxu3 %v2680_v18  ;;  %v3179_v50 = vld [vmem:[%s4592_s11 + $0x10c] sm:$0xf0]  ;;  %v2623_v51 = vld [vmem:[%s4592_s11 + $0xe8] sm:$0xf]  ;;  %v3176_v52 = vld [vmem:[%s4592_s11 + $0xf4] sm:$0xf0]  ;;  %v2572_v62 = vor.u32 %v3161_v47, %v2569_v48 }
  0x39   : > { %927 = vmatpush.bf16.msra.mxu0 %v2448_v1  ;;  %v3193_v54 = vld [vmem:[%s4592_s11 + $0x184] sm:$0xf]  ;;  %v2697_v55 = vld [vmem:[%s4592_s11 + $0x190] sm:$0xf0]  ;;  %v2751_v56 = vld [vmem:[%s4592_s11 + $0x1e8] sm:$0xf]  ;;  %v2632_v60 = vor.u32 %v3179_v50, %v2631_v46  ;;  %v2624_v61 = vor.u32 %v3176_v52, %v2623_v51 }
  0x3a   : > { %940 = vmatpush.bf16.msra.mxu1 %v2452_v6  ;;  %1366 = vmatpush.bf16.msra.mxu2 %v2536_v31  ;;  %v3208_v58 = vld [vmem:[%s4592_s11 + $0x1f4] sm:$0xf0]  ;;  %v2700_v0 = vor.u32 %v3193_v54, %v2697_v55  ;;  %v3157_v1 = vld [vmem:[%s4592_s11 + $0x64] sm:$0xf]  ;;  %v2553_v2 = vld [vmem:[%s4592_s11 + $0x70] sm:$0xf0] }
  0x3b   : > { %v2752_v63 = vor.u32 %v3208_v58, %v2751_v56  ;;  %v3189_v3 = vld [vmem:[%s4592_s11 + $0x164] sm:$0xf]  ;;  %v2681_v4 = vld [vmem:[%s4592_s11 + $0x170] sm:$0xf0]  ;;  %v2556_v5 = vor.u32 %v3157_v1, %v2553_v2  ;;  %v3174_v23 = vld [vmem:[%s4592_s11 + $0xec] sm:$0xf] }
  0x3c   : > { %1379 = vmatpush.bf16.msra.mxu3 %v2664_v32  ;;  %v2684_v6 = vor.u32 %v3189_v3, %v2681_v4  ;;  %v3153_v7 = vld [vmem:[%s4592_s11 + $0x44] sm:$0xf]  ;;  %v2537_v8 = vld [vmem:[%s4592_s11 + $0x50] sm:$0xf0]  ;;  %v2625_v24 = vld [vmem:[%s4592_s11 + $0xf8] sm:$0xf0] }
  0x3d   : > { %928 = vmatpush.bf16.msra.mxu0 %v2440_v16  ;;  %v3185_v9 = vld [vmem:[%s4592_s11 + $0x144] sm:$0xf]  ;;  %v2665_v10 = vld [vmem:[%s4592_s11 + $0x150] sm:$0xf0]  ;;  %v2540_v11 = vor.u32 %v3153_v7, %v2537_v8  ;;  %v2753_v26 = vld [vmem:[%s4592_s11 + $0x1f8] sm:$0xf0]  ;;  %v2628_v29 = vor.u32 %v3174_v23, %v2625_v24 }
  0x3e   : > { %941 = vmatpush.bf16.msra.mxu1 %v2444_v21  ;;  %1367 = vmatpush.bf16.msra.mxu2 %v2520_v43  ;;  %v2668_v12 = vor.u32 %v3185_v9, %v2665_v10  ;;  %v3149_v13 = vld [vmem:[%s4592_s11 + $0x24] sm:$0xf]  ;;  %v2521_v14 = vld [vmem:[%s4592_s11 + $0x30] sm:$0xf0]  ;;  %v2607_v31 = vld [vmem:[%s4592_s11 + $0xc8] sm:$0xf] }
  0x3f   : > { %v3181_v15 = vld [vmem:[%s4592_s11 + $0x124] sm:$0xf]  ;;  %v2649_v16 = vld [vmem:[%s4592_s11 + $0x130] sm:$0xf0]  ;;  %v2524_v17 = vor.u32 %v3149_v13, %v2521_v14  ;;  %v3172_v32 = vld [vmem:[%s4592_s11 + $0xd4] sm:$0xf0] }
  0x40   : > { %929 = vmatmul.bf16.vlgmr.msra.gmra.mxu0 %v818_v28  ;;  %1380 = vmatpush.bf16.msra.mxu3 %v2648_v49  ;;  %v2652_v18 = vor.u32 %v3181_v15, %v2649_v16  ;;  %v3145_v19 = vld [vmem:[%s4592_s11 + $0x4] sm:$0xf]  ;;  %v2505_v20 = vld [vmem:[%s4592_s11 + $0x10] sm:$0xf0]  ;;  %v2735_v33 = vld [vmem:[%s4592_s11 + $0x1c8] sm:$0xf]  ;;  %v2608_v34 = vor.u32 %v3172_v32, %v2607_v31 }
  0x41   : > { %1387 = vmatpush.bf16.msrb.mxu0 %v2620_v22  ;;  %942 = vmatmul.bf16.vlgmr.msra.gmra.mxu1 %v818_v28  ;;  %v3177_v21 = vld [vmem:[%s4592_s11 + $0x104] sm:$0xf]  ;;  %v2633_v22 = vld [vmem:[%s4592_s11 + $0x110] sm:$0xf0]  ;;  %v2508_v27 = vor.u32 %v3145_v19, %v2505_v20  ;;  %v3170_v36 = vld [vmem:[%s4592_s11 + $0xcc] sm:$0xf] }
  0x42   : > { %1400 = vmatpush.bf16.msrb.mxu1 %v2748_v25  ;;  %1368 = vmatpush.bf16.msra.mxu2 %v2504_v59  ;;  %v3206_v25 = vld [vmem:[%s4592_s11 + $0x1ec] sm:$0xf]  ;;  %v2636_v28 = vor.u32 %v3177_v21, %v2633_v22  ;;  %v2609_v37 = vld [vmem:[%s4592_s11 + $0xd8] sm:$0xf0]  ;;  %v2591_v43 = vld [vmem:[%s4592_s11 + $0xa8] sm:$0xf] }
  0x43   : > { %v2756_v30 = vor.u32 %v3206_v25, %v2753_v26  ;;  %v3202_v40 = vld [vmem:[%s4592_s11 + $0x1cc] sm:$0xf]  ;;  %v2737_v41 = vld [vmem:[%s4592_s11 + $0x1d8] sm:$0xf0]  ;;  %v3168_v44 = vld [vmem:[%s4592_s11 + $0xb4] sm:$0xf0] }
  0x44   : > { %1381 = vmatpush.bf16.msra.mxu3 %v2632_v60  ;;  %v2740_v42 = vor.u32 %v3202_v40, %v2737_v41  ;;  %v2719_v45 = vld [vmem:[%s4592_s11 + $0x1a8] sm:$0xf]  ;;  %v2592_v46 = vor.u32 %v3168_v44, %v2591_v43  ;;  %v3200_v47 = vld [vmem:[%s4592_s11 + $0x1b4] sm:$0xf0]  ;;  %v3166_v48 = vld [vmem:[%s4592_s11 + $0xac] sm:$0xf] }
  0x45   : > { %1388 = vmatpush.bf16.msrb.mxu0 %v2604_v35  ;;  %v3204_v35 = vld [vmem:[%s4592_s11 + $0x1d4] sm:$0xf0]  ;;  %v2720_v49 = vor.u32 %v3200_v47, %v2719_v45  ;;  %v2593_v50 = vld [vmem:[%s4592_s11 + $0xb8] sm:$0xf0]  ;;  %v3198_v51 = vld [vmem:[%s4592_s11 + $0x1ac] sm:$0xf] }
  0x46   : > { %1401 = vmatpush.bf16.msrb.mxu1 %v2732_v39  ;;  %1413 = vmatpush.bf16.msrb.mxu2 %v2624_v61  ;;  %v2736_v38 = vor.u32 %v3204_v35, %v2735_v33  ;;  %v2612_v39 = vor.u32 %v3170_v36, %v2609_v37  ;;  %v2596_v52 = vor.u32 %v3166_v48, %v2593_v50  ;;  %v2575_v55 = vld [vmem:[%s4592_s11 + $0x88] sm:$0xf]  ;;  %v3164_v56 = vld [vmem:[%s4592_s11 + $0x94] sm:$0xf0]  ;;  %v3162_v60 = vld [vmem:[%s4592_s11 + $0x8c] sm:$0xf] }
  0x47   : > { %v2703_v58 = vld [vmem:[%s4592_s11 + $0x188] sm:$0xf]  ;;  %v3196_v59 = vld [vmem:[%s4592_s11 + $0x194] sm:$0xf0]  ;;  %v3158_v8 = vld [vmem:[%s4592_s11 + $0x6c] sm:$0xf] }
  0x48   : > { %1426 = vmatpush.bf16.msrb.mxu3 %v2752_v63  ;;  %v2704_v61 = vor.u32 %v3196_v59, %v2703_v58  ;;  %v3194_v63 = vld [vmem:[%s4592_s11 + $0x18c] sm:$0xf]  ;;  %v2559_v3 = vld [vmem:[%s4592_s11 + $0x68] sm:$0xf]  ;;  %v3160_v4 = vld [vmem:[%s4592_s11 + $0x74] sm:$0xf0] }
  0x49   : > { %1389 = vmatpush.bf16.msrb.mxu0 %v2588_v53  ;;  %v2721_v53 = vld [vmem:[%s4592_s11 + $0x1b8] sm:$0xf0]  ;;  %v3192_v7 = vld [vmem:[%s4592_s11 + $0x174] sm:$0xf0]  ;;  %v2543_v14 = vld [vmem:[%s4592_s11 + $0x48] sm:$0xf] }
  0x4a   : > { %1402 = vmatpush.bf16.msrb.mxu1 %v2716_v57  ;;  %1414 = vmatpush.bf16.msrb.mxu2 %v2608_v34  ;;  %v2724_v54 = vor.u32 %v3198_v51, %v2721_v53  ;;  %v2576_v57 = vor.u32 %v3164_v56, %v2575_v55  ;;  %v2561_v9 = vld [vmem:[%s4592_s11 + $0x78] sm:$0xf0]  ;;  %v3156_v16 = vld [vmem:[%s4592_s11 + $0x54] sm:$0xf0]  ;;  %v3154_v21 = vld [vmem:[%s4592_s11 + $0x4c] sm:$0xf] }
  0x4b   : > { %v2689_v13 = vld [vmem:[%s4592_s11 + $0x178] sm:$0xf0]  ;;  %v2544_v19 = vor.u32 %v3156_v16, %v2543_v14  ;;  %v3186_v23 = vld [vmem:[%s4592_s11 + $0x14c] sm:$0xf]  ;;  %v2527_v26 = vld [vmem:[%s4592_s11 + $0x28] sm:$0xf] }
  0x4c   : > { %1427 = vmatpush.bf16.msrb.mxu3 %v2736_v38  ;;  %v2545_v22 = vld [vmem:[%s4592_s11 + $0x58] sm:$0xf0]  ;;  %v3150_v31 = vld [vmem:[%s4592_s11 + $0x2c] sm:$0xf]  ;;  %v2511_v37 = vld [vmem:[%s4592_s11 + $0x8] sm:$0xf] }
  0x4d   : > { %1390 = vmatpush.bf16.msrb.mxu0 %v2572_v62  ;;  %v2577_v62 = vld [vmem:[%s4592_s11 + $0x98] sm:$0xf0]  ;;  %v2548_v24 = vor.u32 %v3154_v21, %v2545_v22  ;;  %v3182_v34 = vld [vmem:[%s4592_s11 + $0x12c] sm:$0xf]  ;;  %v3148_v38 = vld [vmem:[%s4592_s11 + $0x14] sm:$0xf0] }
  0x4e   : > { %1403 = vmatpush.bf16.msrb.mxu1 %v2700_v0  ;;  %1415 = vmatpush.bf16.msrb.mxu2 %v2592_v46  ;;  %v2705_v0 = vld [vmem:[%s4592_s11 + $0x198] sm:$0xf0]  ;;  %v2580_v1 = vor.u32 %v3162_v60, %v2577_v62  ;;  %v2639_v40 = vld [vmem:[%s4592_s11 + $0x108] sm:$0xf]  ;;  %v3180_v41 = vld [vmem:[%s4592_s11 + $0x114] sm:$0xf0]  ;;  %v2512_v45 = vor.u32 %v3148_v38, %v2511_v37 }
  0x4f   : > { %v2708_v2 = vor.u32 %v3194_v63, %v2705_v0  ;;  %v2673_v25 = vld [vmem:[%s4592_s11 + $0x158] sm:$0xf0]  ;;  %v3146_v43 = vld [vmem:[%s4592_s11 + $0xc] sm:$0xf]  ;;  %v2640_v48 = vor.u32 %v3180_v41, %v2639_v40  ;;  %v835_v51 = vld [vmem:[%s4596_s27] sm:$0x3] }
  0x50   : > { %1428 = vmatpush.bf16.msrb.mxu3 %v2720_v49  ;;  %v2529_v33 = vld [vmem:[%s4592_s11 + $0x38] sm:$0xf0]  ;;  %v3178_v46 = vld [vmem:[%s4592_s11 + $0x10c] sm:$0xf]  ;;  %v949_v53 = vld [vmem:[%s4597_s3] sm:$0x3] }
  0x51   : > { %1391 = vmatpush.bf16.msrb.mxu0 %v2556_v5  ;;  %v2687_v5 = vld [vmem:[%s4592_s11 + $0x168] sm:$0xf]  ;;  %v2657_v35 = vld [vmem:[%s4592_s11 + $0x138] sm:$0xf0]  ;;  %v957_v56 = vld [vmem:[%s4598_s7] sm:$0x3] }
  0x52   : > { %1404 = vmatpush.bf16.msrb.mxu1 %v2684_v6  ;;  %1416 = vmatpush.bf16.msrb.mxu2 %v2576_v57  ;;  %v2560_v6 = vor.u32 %v3160_v4, %v2559_v3  ;;  %v2688_v10 = vor.u32 %v3192_v7, %v2687_v5  ;;  %v2513_v44 = vld [vmem:[%s4592_s11 + $0x18] sm:$0xf0]  ;;  %v951_v58 = vperm.slane %v949_v53, 0  ;;  %v959_v63 = vperm.slane %v957_v56, 0  ;;  %s4599_s0 = sld [smem:[#allocation14_spill]] }
  0x53   : > { %v2641_v47 = vld [vmem:[%s4592_s11 + $0x118] sm:$0xf0]  ;;  %v2516_v49 = vor.u32 %v3146_v43, %v2513_v44  ;;  %s4600_s5 = sld [smem:[#allocation11_spill]] }
  0x54   : > { %1429 = vmatpush.bf16.msrb.mxu3 %v2704_v61  ;;  %v2644_v50 = vor.u32 %v3178_v46, %v2641_v47  ;;  %v952_v61 = vperm.slane %v949_v53, 1  ;;  %s4601_s8 = sld [smem:[#allocation12_spill]] }
  0x55   : > { %1392 = vmatpush.bf16.msrb.mxu0 %v2540_v11  ;;  %v2564_v11 = vor.u32 %v3158_v8, %v2561_v9  ;;  %s4602_s27 = sld [smem:[#allocation13_spill]] }
  0x56   : > { %1405 = vmatpush.bf16.msrb.mxu1 %v2668_v12  ;;  %v3190_v12 = vld [vmem:[%s4592_s11 + $0x16c] sm:$0xf]  ;;  %1417 = vmatpush.bf16.msrb.mxu2 %v2560_v6  ;;  %s4603_s3 = sld [smem:[#allocation15_spill]] }
  0x57   : > { %v2692_v15 = vor.u32 %v3190_v12, %v2689_v13  ;;  %s4604_s1 = sld [smem:[#allocation16_spill]] }
  0x58   : > { %1430 = vmatpush.bf16.msrb.mxu3 %v2688_v10  ;;  %v2879_v3 = vld [vmem:[%s4599_s0 + $0xf0] sm:$0xf]  ;;  %v3240_v4 = vld [vmem:[%s4599_s0 + $0xf4] sm:$0xf0]  ;;  %v2807_v22 = vld [vmem:[%s4599_s0 + $0x60] sm:$0xf] }
  0x59   : > { %1393 = vmatpush.bf16.msrb.mxu0 %v2524_v17  ;;  %v2671_v17 = vld [vmem:[%s4592_s11 + $0x148] sm:$0xf]  ;;  %v2815_v6 = vld [vmem:[%s4599_s0 + $0x70] sm:$0xf]  ;;  %v3224_v7 = vld [vmem:[%s4599_s0 + $0x74] sm:$0xf0] }
  0x5a   : > { %1406 = vmatpush.bf16.msrb.mxu1 %v2652_v18  ;;  %v3188_v18 = vld [vmem:[%s4592_s11 + $0x154] sm:$0xf0]  ;;  %1418 = vmatpush.bf16.msrb.mxu2 %v2544_v19  ;;  %v3007_v8 = vld [vmem:[%s4599_s0 + $0x1f0] sm:$0xf]  ;;  %v3238_v19 = vld [vmem:[%s4599_s0 + $0xe4] sm:$0xf0] }
  0x5b   : > { %v2672_v20 = vor.u32 %v3188_v18, %v2671_v17  ;;  %v3272_v10 = vld [vmem:[%s4599_s0 + $0x1f4] sm:$0xf0]  ;;  %v2880_v17 = vor.u32 %v3240_v4, %v2879_v3  ;;  %v2871_v18 = vld [vmem:[%s4599_s0 + $0xe0] sm:$0xf]  ;;  %v2991_v37 = vld [vmem:[%s4599_s0 + $0x1d0] sm:$0xf] }
  0x5c   : > { %v3256_v12 = vld [vmem:[%s4599_s0 + $0x174] sm:$0xf0]  ;;  %v2927_v40 = vld [vmem:[%s4599_s0 + $0x150] sm:$0xf]  ;;  %v2855_v43 = vld [vmem:[%s4599_s0 + $0xc0] sm:$0xf] }
  0x5d   : > { %1394 = vmatpush.bf16.msrb.mxu0 %v2508_v27  ;;  %v3152_v27 = vld [vmem:[%s4592_s11 + $0x34] sm:$0xf0]  ;;  %1431 = vmatpush.bf16.msrb.mxu3 %v2672_v20  ;;  %v2816_v20 = vor.u32 %v3224_v7, %v2815_v6  ;;  %v2791_v46 = vld [vmem:[%s4599_s0 + $0x40] sm:$0xf]  ;;  %v3218_v47 = vld [vmem:[%s4599_s0 + $0x44] sm:$0xf0] }
  0x5e   : > { %1407 = vmatpush.bf16.msrb.mxu1 %v2636_v28  ;;  %v2676_v28 = vor.u32 %v3186_v23, %v2673_v25  ;;  %v2528_v32 = vor.u32 %v3152_v27, %v2527_v26  ;;  %v3222_v23 = vld [vmem:[%s4599_s0 + $0x64] sm:$0xf0]  ;;  %v2999_v25 = vld [vmem:[%s4599_s0 + $0x1e0] sm:$0xf]  ;;  %v3252_v41 = vld [vmem:[%s4599_s0 + $0x154] sm:$0xf0] }
  0x5f   : > { %v3270_v27 = vld [vmem:[%s4599_s0 + $0x1e4] sm:$0xf0]  ;;  %v2847_v53 = vld [vmem:[%s4599_s0 + $0xb0] sm:$0xf]  ;;  %v3228_v4 = vld [vmem:[%s4599_s0 + $0x94] sm:$0xf0] }
  0x60   : > { %1419 = vmatpush.bf16.msrb.mxu2 %v2528_v32  ;;  %v3236_v32 = vld [vmem:[%s4599_s0 + $0xd4] sm:$0xf0]  ;;  %s4606_s6 = sld [smem:[#allocation17_spill]] }
  0x61   : > { %1439 = vmatpush.bf16.msra.mxu0 %v2628_v29  ;;  %v2655_v29 = vld [vmem:[%s4592_s11 + $0x128] sm:$0xf]  ;;  %v3212_v6 = vld [vmem:[%s4599_s0 + $0x14] sm:$0xf0] }
  0x62   : > { %1452 = vmatpush.bf16.msra.mxu1 %v2756_v30  ;;  %v3184_v30 = vld [vmem:[%s4592_s11 + $0x134] sm:$0xf0] }
  0x63   : > { %v2656_v36 = vor.u32 %v3184_v30, %v2655_v29  ;;  %v3254_v29 = vld [vmem:[%s4599_s0 + $0x164] sm:$0xf0]  ;;  %v2872_v30 = vor.u32 %v3238_v19, %v2871_v18  ;;  %v3237_v18 = vld [vmem:[%s4599_s0 + $0xe4] sm:$0xf]  ;;  %v2873_v19 = vld [vmem:[%s4599_s0 + $0xe8] sm:$0xf0] }
  0x64   : > { %1420 = vmatpush.bf16.msrb.mxu2 %v2512_v45  ;;  %v3234_v45 = vld [vmem:[%s4599_s0 + $0xc4] sm:$0xf0] }
  0x65   : > { %1440 = vmatpush.bf16.msra.mxu0 %v2612_v39  ;;  %v2532_v39 = vor.u32 %v3150_v31, %v2529_v33  ;;  %1432 = vmatpush.bf16.msrb.mxu3 %v2656_v36  ;;  %v2863_v31 = vld [vmem:[%s4599_s0 + $0xd0] sm:$0xf]  ;;  %v2808_v33 = vor.u32 %v3222_v23, %v2807_v22  ;;  %v3000_v36 = vor.u32 %v3270_v27, %v2999_v25  ;;  %v3210_v22 = vld [vmem:[%s4599_s0 + $0x4] sm:$0xf0]  ;;  %v2919_v23 = vld [vmem:[%s4599_s0 + $0x140] sm:$0xf] }
  0x66   : > { %1453 = vmatpush.bf16.msra.mxu1 %v2740_v42  ;;  %v2660_v42 = vor.u32 %v3182_v34, %v2657_v35  ;;  %v2799_v34 = vld [vmem:[%s4599_s0 + $0x50] sm:$0xf]  ;;  %v3220_v35 = vld [vmem:[%s4599_s0 + $0x54] sm:$0xf0]  ;;  %v3250_v25 = vld [vmem:[%s4599_s0 + $0x144] sm:$0xf0]  ;;  %s815_s10 = scalar_lea.vmem %s4606_s6, %s2435_s26 }
  0x67   : > { %v2800_v44 = vor.u32 %v3220_v35, %v2799_v34  ;;  %v2817_v27 = vld [vmem:[%s4599_s0 + $0x78] sm:$0xf0] }
  0x68   : > { %v2865_v34 = vld [vmem:[%s4599_s0 + $0xd8] sm:$0xf0] }
  0x69   : > { %1441 = vmatpush.bf16.msra.mxu0 %v2596_v52  ;;  %1433 = vmatpush.bf16.msrb.mxu3 %v2640_v48  ;;  %v837_v52 = vperm.slane %v835_v51, 0 }
  0x6a   : > { %1454 = vmatpush.bf16.msra.mxu1 %v2724_v54  ;;  %v838_v54 = vperm.slane %v835_v51, 1  ;;  %v3266_v51 = vld [vmem:[%s4599_s0 + $0x1c4] sm:$0xf0] }
  0x6d   : > { %1442 = vmatpush.bf16.msra.mxu0 %v2580_v1  ;;  %v960_v1 = vperm.slane %v957_v56, 1  ;;  %v2783_v56 = vld [vmem:[%s4599_s0 + $0x30] sm:$0xf] }
  0x6e   : > { %1455 = vmatpush.bf16.msra.mxu1 %v2708_v2 }
  0x71   : > { %1443 = vmatpush.bf16.msra.mxu0 %v2564_v11  ;;  %v2943_v11 = vld [vmem:[%s4599_s0 + $0x170] sm:$0xf] }
  0x72   : > { %1456 = vmatpush.bf16.msra.mxu1 %v2692_v15  ;;  %v2944_v26 = vor.u32 %v3256_v12, %v2943_v11  ;;  %v3239_v11 = vld [vmem:[%s4599_s0 + $0xf4] sm:$0xf]  ;;  %v2881_v12 = vld [vmem:[%s4599_s0 + $0xf8] sm:$0xf0] }
  0x75   : > { %1444 = vmatpush.bf16.msra.mxu0 %v2548_v24  ;;  %v3008_v24 = vor.u32 %v3272_v10, %v3007_v8  ;;  %v3226_v10 = vld [vmem:[%s4599_s0 + $0x84] sm:$0xf0] }
  0x76   : > { %1457 = vmatpush.bf16.msra.mxu1 %v2676_v28  ;;  %v2935_v28 = vld [vmem:[%s4599_s0 + $0x160] sm:$0xf] }
  0x77   : > { %v2936_v38 = vor.u32 %v3254_v29, %v2935_v28  ;;  %v2920_v28 = vor.u32 %v3250_v25, %v2919_v23 }
  0x79   : > { %1445 = vmatpush.bf16.msra.mxu0 %v2532_v39  ;;  %v3268_v39 = vld [vmem:[%s4599_s0 + $0x1d4] sm:$0xf0] }
  0x7a   : > { %1458 = vmatpush.bf16.msra.mxu1 %v2660_v42  ;;  %v2864_v42 = vor.u32 %v3236_v32, %v2863_v31  ;;  %v2992_v48 = vor.u32 %v3268_v39, %v2991_v37  ;;  %v3262_v31 = vld [vmem:[%s4599_s0 + $0x1a4] sm:$0xf0]  ;;  %v3248_v37 = vld [vmem:[%s4599_s0 + $0x134] sm:$0xf0]  ;;  %v3221_v39 = vld [vmem:[%s4599_s0 + $0x64] sm:$0xf] }
  0x7d   : > { %1446 = vmatpush.bf16.msra.mxu0 %v2516_v49  ;;  %v2928_v49 = vor.u32 %v3252_v41, %v2927_v40  ;;  %v2809_v40 = vld [vmem:[%s4599_s0 + $0x68] sm:$0xf0] }
  0x7e   : > { %1459 = vmatpush.bf16.msra.mxu1 %v2644_v50  ;;  %v2983_v50 = vld [vmem:[%s4599_s0 + $0x1c0] sm:$0xf]  ;;  %v2812_v41 = vor.u32 %v3221_v39, %v2809_v40  ;;  %v3211_v39 = vld [vmem:[%s4599_s0 + $0x14] sm:$0xf]  ;;  %v2769_v40 = vld [vmem:[%s4599_s0 + $0x18] sm:$0xf0] }
  0xbd   : > { %v930_v55 = vpop.f32.mrf.mxu0 }
  0xbe   : > { %v931_v57 = vadd.f32 %v930_v55, %v837_v52  ;;  %v943_v59 = vpop.f32.mrf.mxu1  ;;  %v2856_v52 = vor.u32 %v3234_v45, %v2855_v43  ;;  %v3232_v55 = vld [vmem:[%s4599_s0 + $0xb4] sm:$0xf0]  ;;  %v3233_v45 = vld [vmem:[%s4599_s0 + $0xc4] sm:$0xf] }
  0xbf   : > { %v944_v60 = vadd.f32 %v943_v59, %v838_v54  ;;  %v2792_v54 = vor.u32 %v3218_v47, %v2791_v46  ;;  %v2848_v59 = vor.u32 %v3232_v55, %v2847_v53  ;;  %v3260_v43 = vld [vmem:[%s4599_s0 + $0x194] sm:$0xf0]  ;;  %v2857_v46 = vld [vmem:[%s4599_s0 + $0xc8] sm:$0xf0]  ;;  %v3258_v55 = vld [vmem:[%s4599_s0 + $0x184] sm:$0xf0] }
  0xc0   : > { %v947_v62 = vmax.f32 %v931_v57, 0.0  ;;  %v3216_v57 = vld [vmem:[%s4599_s0 + $0x34] sm:$0xf0]  ;;  %v2860_v47 = vor.u32 %v3233_v45, %v2857_v46  ;;  %v3263_v45 = vld [vmem:[%s4599_s0 + $0x1b4] sm:$0xf] }
  0xc1   : > { %v948_v0 = vmax.f32 %v944_v60, 0.0  ;;  %v2839_v60 = vld [vmem:[%s4599_s0 + $0xa0] sm:$0xf]  ;;  %v2977_v46 = vld [vmem:[%s4599_s0 + $0x1b8] sm:$0xf0] }
  0xc2   : > { %v955_v2 = vmul.f32 %v951_v58, %v947_v62  ;;  %v2984_v58 = vor.u32 %v3266_v51, %v2983_v50  ;;  %v3230_v62 = vld [vmem:[%s4599_s0 + $0xa4] sm:$0xf0]  ;;  %v3219_v51 = vld [vmem:[%s4599_s0 + $0x54] sm:$0xf] }
  0xc3   : > { %v956_v5 = vmul.f32 %v952_v61, %v948_v0  ;;  %v2784_v61 = vor.u32 %v3216_v57, %v2783_v56  ;;  %v3214_v0 = vld [vmem:[%s4599_s0 + $0x24] sm:$0xf0]  ;;  %v3231_v57 = vld [vmem:[%s4599_s0 + $0xb4] sm:$0xf] }
  0xc4   : > { %v963_v9 = vadd.f32 %v959_v63, %v955_v2  ;;  %v2775_v63 = vld [vmem:[%s4599_s0 + $0x20] sm:$0xf]  ;;  %v2831_v2 = vld [vmem:[%s4599_s0 + $0x90] sm:$0xf] }
  0xc5   : > { %v964_v13 = vadd.f32 %v960_v1, %v956_v5  ;;  %v932_v14 = vpop.f32.mrf.mxu0  ;;  %v2840_v1 = vor.u32 %v3230_v62, %v2839_v60  ;;  %v2776_v3 = vor.u32 %v3214_v0, %v2775_v63  ;;  %v2767_v5 = vld [vmem:[%s4599_s0 + $0x10] sm:$0xf]  ;;  %v2832_v7 = vor.u32 %v3228_v4, %v2831_v2  ;;  %v3244_v0 = vld [vmem:[%s4599_s0 + $0x114] sm:$0xf0]  ;;  %v2793_v2 = vld [vmem:[%s4599_s0 + $0x48] sm:$0xf0] }
  0xc6   : > { %v4014_v15 = vpack.c.bf16 %v963_v9, %v963_v9  ;;  %v945_v16 = vpop.f32.mrf.mxu1  ;;  %v2768_v8 = vor.u32 %v3212_v6, %v2767_v5  ;;  %v2823_v9 = vld [vmem:[%s4599_s0 + $0x80] sm:$0xf]  ;;  %v2884_v14 = vor.u32 %v3239_v11, %v2881_v12  ;;  %v2895_v62 = vld [vmem:[%s4599_s0 + $0x110] sm:$0xf]  ;;  %v3229_v5 = vld [vmem:[%s4599_s0 + $0xa4] sm:$0xf] }
  0xc7   : > { %v4022_v21 = vpack.c.bf16 %v964_v13, %v964_v13  ;;  %v2824_v13 = vor.u32 %v3226_v10, %v2823_v9  ;;  %v3264_v16 = vld [vmem:[%s4599_s0 + $0x1b4] sm:$0xf0]  ;;  %v2841_v6 = vld [vmem:[%s4599_s0 + $0xa8] sm:$0xf0]  ;;  %v2887_v10 = vld [vmem:[%s4599_s0 + $0x100] sm:$0xf] }
  0xc8   : > { %1369 = vmatmul.bf16.vlgmr.msra.gmra.mxu2 %v4014_v15  ;;  %1395 = vmatmul.bf16.vlgmr.msrb.gmra.mxu0 %v4014_v15  ;;  %v3001_v9 = vld [vmem:[%s4599_s0 + $0x1e8] sm:$0xf0]  ;;  %v3242_v12 = vld [vmem:[%s4599_s0 + $0x104] sm:$0xf0] }
  0xc9   : > { %1382 = vmatmul.bf16.vlgmr.msra.gmra.mxu3 %v4022_v21  ;;  %1408 = vmatmul.bf16.vlgmr.msrb.gmra.mxu1 %v4022_v21 }
  0xca   : > { %1904 = vmatpush.bf16.msra.mxu3 %v2880_v17  ;;  %1891 = vmatpush.bf16.msra.mxu2 %v2816_v20  ;;  %v2876_v20 = vor.u32 %v3237_v18, %v2873_v19  ;;  %v2945_v18 = vld [vmem:[%s4599_s0 + $0x178] sm:$0xf0] }
  0xcb   : > { %1930 = vmatpush.bf16.msrb.mxu1 %v3008_v24  ;;  %1917 = vmatpush.bf16.msrb.mxu0 %v2944_v26  ;;  %v3223_v26 = vld [vmem:[%s4599_s0 + $0x74] sm:$0xf] }
  0xcc   : > { %v2820_v29 = vor.u32 %v3223_v26, %v2817_v27  ;;  %v3213_v26 = vld [vmem:[%s4599_s0 + $0x24] sm:$0xf]  ;;  %v2777_v27 = vld [vmem:[%s4599_s0 + $0x28] sm:$0xf0] }
  0xce   : > { %1905 = vmatpush.bf16.msra.mxu3 %v2872_v30  ;;  %1892 = vmatpush.bf16.msra.mxu2 %v2808_v33  ;;  %v2967_v30 = vld [vmem:[%s4599_s0 + $0x1a0] sm:$0xf]  ;;  %v3235_v33 = vld [vmem:[%s4599_s0 + $0xd4] sm:$0xf] }
  0xcf   : > { %1931 = vmatpush.bf16.msrb.mxu1 %v3000_v36  ;;  %1918 = vmatpush.bf16.msrb.mxu0 %v2936_v38  ;;  %v2968_v32 = vor.u32 %v3262_v31, %v2967_v30  ;;  %v2868_v35 = vor.u32 %v3235_v33, %v2865_v34  ;;  %v2911_v36 = vld [vmem:[%s4599_s0 + $0x130] sm:$0xf]  ;;  %v2937_v30 = vld [vmem:[%s4599_s0 + $0x168] sm:$0xf0]  ;;  %v3265_v34 = vld [vmem:[%s4599_s0 + $0x1c4] sm:$0xf] }
  0xd0   : > { %v2912_v38 = vor.u32 %v3248_v37, %v2911_v36  ;;  %v2825_v33 = vld [vmem:[%s4599_s0 + $0x88] sm:$0xf0] }
  0xd1   : > { %v2985_v37 = vld [vmem:[%s4599_s0 + $0x1c8] sm:$0xf0] }
  0xd2   : > { %1906 = vmatpush.bf16.msra.mxu3 %v2864_v42  ;;  %1893 = vmatpush.bf16.msra.mxu2 %v2800_v44  ;;  %v2959_v42 = vld [vmem:[%s4599_s0 + $0x190] sm:$0xf] }
  0xd3   : > { %1932 = vmatpush.bf16.msrb.mxu1 %v2992_v48  ;;  %1919 = vmatpush.bf16.msrb.mxu0 %v2928_v49  ;;  %v2960_v44 = vor.u32 %v3260_v43, %v2959_v42  ;;  %v2903_v48 = vld [vmem:[%s4599_s0 + $0x120] sm:$0xf]  ;;  %v3246_v49 = vld [vmem:[%s4599_s0 + $0x124] sm:$0xf0]  ;;  %v2772_v42 = vor.u32 %v3211_v39, %v2769_v40  ;;  %v2929_v43 = vld [vmem:[%s4599_s0 + $0x158] sm:$0xf0] }
  0xd4   : > { %v2904_v50 = vor.u32 %v3246_v49, %v2903_v48  ;;  %v4341_v48 = vld [vmem:[%s4601_s8] sm:$0xf]  ;;  %v2980_v49 = vor.u32 %v3263_v45, %v2977_v46 }
  0xd5   : > { %v1474_v45 = vperm.slane %v4341_v48, 3 }
  0xd6   : > { %1907 = vmatpush.bf16.msra.mxu3 %v2856_v52  ;;  %1894 = vmatpush.bf16.msra.mxu2 %v2792_v54  ;;  %v2801_v52 = vld [vmem:[%s4599_s0 + $0x58] sm:$0xf0]  ;;  %v2951_v54 = vld [vmem:[%s4599_s0 + $0x180] sm:$0xf] }
  0xd7   : > { %1933 = vmatpush.bf16.msrb.mxu1 %v2984_v58  ;;  %1920 = vmatpush.bf16.msrb.mxu0 %v2920_v28  ;;  %v2804_v53 = vor.u32 %v3219_v51, %v2801_v52  ;;  %v2952_v56 = vor.u32 %v3258_v55, %v2951_v54  ;;  %v2849_v58 = vld [vmem:[%s4599_s0 + $0xb8] sm:$0xf0]  ;;  %v2780_v28 = vor.u32 %v3213_v26, %v2777_v27  ;;  %v2761_v51 = vld [vmem:[%s4599_s0 + $0x8] sm:$0xf0]  ;;  %v3249_v52 = vld [vmem:[%s4599_s0 + $0x144] sm:$0xf] }
  0xd8   : > { %1421 = vmatmul.bf16.vlgmr.msrb.gmra.mxu2 %v4014_v15  ;;  %1447 = vmatmul.bf16.vlgmr.msra.gmra.mxu0 %v4014_v15  ;;  %v2975_v15 = vld [vmem:[%s4599_s0 + $0x1b0] sm:$0xf]  ;;  %v2852_v60 = vor.u32 %v3231_v57, %v2849_v58  ;;  %v2921_v54 = vld [vmem:[%s4599_s0 + $0x148] sm:$0xf0]  ;;  %v3261_v57 = vld [vmem:[%s4599_s0 + $0x1a4] sm:$0xf] }
  0xd9   : > { %1434 = vmatmul.bf16.vlgmr.msrb.gmra.mxu3 %v4022_v21  ;;  %1460 = vmatmul.bf16.vlgmr.msra.gmra.mxu1 %v4022_v21  ;;  %v2976_v17 = vor.u32 %v3264_v16, %v2975_v15  ;;  %v2759_v21 = vld [vmem:[%s4599_s0] sm:$0xf]  ;;  %v2888_v15 = vor.u32 %v3242_v12, %v2887_v10  ;;  %v2969_v58 = vld [vmem:[%s4599_s0 + $0x1a8] sm:$0xf0]  ;;  %v3257_v12 = vld [vmem:[%s4599_s0 + $0x184] sm:$0xf] }
  0xda   : > { %1908 = vmatpush.bf16.msra.mxu3 %v2848_v59  ;;  %1895 = vmatpush.bf16.msra.mxu2 %v2784_v61  ;;  %v2760_v24 = vor.u32 %v3210_v22, %v2759_v21  ;;  %v3271_v59 = vld [vmem:[%s4599_s0 + $0x1f4] sm:$0xf]  ;;  %v3009_v61 = vld [vmem:[%s4599_s0 + $0x1f8] sm:$0xf0] }
  0xdb   : > { %1934 = vmatpush.bf16.msrb.mxu1 %v2976_v17  ;;  %1921 = vmatpush.bf16.msrb.mxu0 %v2912_v38  ;;  %v3012_v63 = vor.u32 %v3271_v59, %v3009_v61  ;;  %v3255_v17 = vld [vmem:[%s4599_s0 + $0x174] sm:$0xf]  ;;  %v2833_v21 = vld [vmem:[%s4599_s0 + $0x98] sm:$0xf0]  ;;  %v2988_v38 = vor.u32 %v3265_v34, %v2985_v37  ;;  %v1472_v61 = vperm.slane %v4341_v48, 1 }
  0xdc   : > { %v2948_v19 = vor.u32 %v3255_v17, %v2945_v18  ;;  %v3267_v22 = vld [vmem:[%s4599_s0 + $0x1d4] sm:$0xf]  ;;  %v2889_v34 = vld [vmem:[%s4599_s0 + $0x108] sm:$0xf0] }
  0xde   : > { %1909 = vmatpush.bf16.msra.mxu3 %v2840_v1  ;;  %1896 = vmatpush.bf16.msra.mxu2 %v2776_v3  ;;  %v3217_v1 = vld [vmem:[%s4599_s0 + $0x44] sm:$0xf]  ;;  %v2896_v3 = vor.u32 %v3244_v0, %v2895_v62  ;;  %v4366_v0 = vld [vmem:[%s4602_s27] sm:$0xf] }
  0xdf   : > { %1935 = vmatpush.bf16.msrb.mxu1 %v2968_v32  ;;  %1922 = vmatpush.bf16.msrb.mxu0 %v2904_v50  ;;  %v2796_v4 = vor.u32 %v3217_v1, %v2793_v2  ;;  %v3225_v32 = vld [vmem:[%s4599_s0 + $0x84] sm:$0xf]  ;;  %v3247_v1 = vld [vmem:[%s4599_s0 + $0x134] sm:$0xf]  ;;  %v2913_v2 = vld [vmem:[%s4599_s0 + $0x138] sm:$0xf0] }
  0xe0   : > { %v2828_v36 = vor.u32 %v3225_v32, %v2825_v33  ;;  %v3209_v50 = vld [vmem:[%s4599_s0 + $0x4] sm:$0xf] }
  0xe1   : > { %v3241_v33 = vld [vmem:[%s4599_s0 + $0x104] sm:$0xf] }
  0xe2   : > { %1910 = vmatpush.bf16.msra.mxu3 %v2832_v7  ;;  %1897 = vmatpush.bf16.msra.mxu2 %v2768_v8  ;;  %v2844_v7 = vor.u32 %v3229_v5, %v2841_v6  ;;  %v3269_v8 = vld [vmem:[%s4599_s0 + $0x1e4] sm:$0xf]  ;;  %v3259_v5 = vld [vmem:[%s4599_s0 + $0x194] sm:$0xf]  ;;  %v2961_v6 = vld [vmem:[%s4599_s0 + $0x198] sm:$0xf0]  ;;  %v2892_v37 = vor.u32 %v3241_v33, %v2889_v34 }
  0xe3   : > { %1936 = vmatpush.bf16.msrb.mxu1 %v2960_v44  ;;  %1923 = vmatpush.bf16.msrb.mxu0 %v2896_v3  ;;  %v3004_v11 = vor.u32 %v3269_v8, %v3001_v9  ;;  %v2964_v8 = vor.u32 %v3259_v5, %v2961_v6  ;;  %v2905_v9 = vld [vmem:[%s4599_s0 + $0x128] sm:$0xf0]  ;;  %v3276_v5 = vld [vmem:[%s4557_s13 + $0x18] sm:$0xff] }
  0xe4   : > { %v3288_v6 = vld [vmem:[%s4557_s13 + $0x78] sm:$0xff] }
  0xe6   : > { %1911 = vmatpush.bf16.msra.mxu3 %v2824_v13  ;;  %1898 = vmatpush.bf16.msra.mxu2 %v2760_v24  ;;  %v3215_v13 = vld [vmem:[%s4599_s0 + $0x34] sm:$0xf]  ;;  %v2993_v24 = vld [vmem:[%s4599_s0 + $0x1d8] sm:$0xf0] }
  0xe7   : > { %1937 = vmatpush.bf16.msrb.mxu1 %v2952_v56  ;;  %1924 = vmatpush.bf16.msrb.mxu0 %v2888_v15  ;;  %v2996_v25 = vor.u32 %v3267_v22, %v2993_v24  ;;  %v2924_v56 = vor.u32 %v3249_v52, %v2921_v54 }
  0xea   : > { %1956 = vmatpush.bf16.msrb.mxu3 %v2884_v14  ;;  %1943 = vmatpush.bf16.msrb.mxu2 %v2820_v29  ;;  %v2785_v14 = vld [vmem:[%s4599_s0 + $0x38] sm:$0xf0]  ;;  %v3253_v29 = vld [vmem:[%s4599_s0 + $0x164] sm:$0xf] }
  0xeb   : > { %1982 = vmatpush.bf16.msra.mxu1 %v3012_v63  ;;  %v2788_v16 = vor.u32 %v3215_v13, %v2785_v14  ;;  %1969 = vmatpush.bf16.msra.mxu0 %v2948_v19  ;;  %v2940_v31 = vor.u32 %v3253_v29, %v2937_v30  ;;  %v2972_v63 = vor.u32 %v3261_v57, %v2969_v58  ;;  %v2953_v13 = vld [vmem:[%s4599_s0 + $0x188] sm:$0xf0]  ;;  %v3243_v19 = vld [vmem:[%s4599_s0 + $0x114] sm:$0xf]  ;;  %v1485_v30 = vperm.slane %v4366_v0, 0 }
  0xec   : > { %v2956_v22 = vor.u32 %v3257_v12, %v2953_v13  ;;  %v1473_v58 = vperm.slane %v4341_v48, 2  ;;  %v3285_v12 = vld [vmem:[%s4557_s13 + $0x60] sm:$0xff]  ;;  %v3284_v13 = vld [vmem:[%s4557_s13 + $0x58] sm:$0xff] }
  0xee   : > { %1957 = vmatpush.bf16.msrb.mxu3 %v2876_v20  ;;  %1944 = vmatpush.bf16.msrb.mxu2 %v2812_v41  ;;  %v3227_v20 = vld [vmem:[%s4599_s0 + $0x94] sm:$0xf] }
  0xef   : > { %1983 = vmatpush.bf16.msra.mxu1 %v3004_v11  ;;  %v2836_v23 = vor.u32 %v3227_v20, %v2833_v21  ;;  %1970 = vmatpush.bf16.msra.mxu0 %v2940_v31  ;;  %v3251_v41 = vld [vmem:[%s4599_s0 + $0x154] sm:$0xf]  ;;  %v1486_v11 = vperm.slane %v4366_v0, 1  ;;  %v2897_v20 = vld [vmem:[%s4599_s0 + $0x118] sm:$0xf0] }
  0xf0   : > { %v2932_v44 = vor.u32 %v3251_v41, %v2929_v43  ;;  %v2900_v27 = vor.u32 %v3243_v19, %v2897_v20 }
  0xf2   : > { %1958 = vmatpush.bf16.msrb.mxu3 %v2868_v35  ;;  %1945 = vmatpush.bf16.msrb.mxu2 %v2804_v53  ;;  %v4314_v35 = vld [vmem:[%s4600_s5] sm:$0xf]  ;;  %v2764_v53 = vor.u32 %v3209_v50, %v2761_v51  ;;  %v1488_v50 = vperm.slane %v4366_v0, 3 }
  0xf3   : > { %1984 = vmatpush.bf16.msra.mxu1 %v2996_v25  ;;  %1971 = vmatpush.bf16.msra.mxu0 %v2932_v44  ;;  %v1033_v62 = vperm.slane %v4314_v35, 0  ;;  %v1471_v25 = vperm.slane %v4341_v48, 0  ;;  %v1036_v32 = vperm.slane %v4314_v35, 3  ;;  %v1035_v46 = vperm.slane %v4314_v35, 2  ;;  %v3279_v48 = vld [vmem:[%s4557_s13 + $0x30] sm:$0xff] }
  0xf6   : > { %1959 = vmatpush.bf16.msrb.mxu3 %v2860_v47  ;;  %1946 = vmatpush.bf16.msrb.mxu2 %v2796_v4  ;;  %v1034_v47 = vperm.slane %v4314_v35, 1  ;;  %v2916_v4 = vor.u32 %v3247_v1, %v2913_v2 }
  0xf7   : > { %1985 = vmatpush.bf16.msra.mxu1 %v2988_v38  ;;  %1972 = vmatpush.bf16.msra.mxu0 %v2924_v56 }
  0xfa   : > { %1960 = vmatpush.bf16.msrb.mxu3 %v2852_v60  ;;  %1947 = vmatpush.bf16.msrb.mxu2 %v2788_v16 }
  0xfb   : > { %1986 = vmatpush.bf16.msra.mxu1 %v2980_v49  ;;  %1973 = vmatpush.bf16.msra.mxu0 %v2916_v4  ;;  %v3277_v4 = vld [vmem:[%s4557_s13 + $0x20] sm:$0xff] }
  0xfe   : > { %1961 = vmatpush.bf16.msrb.mxu3 %v2844_v7  ;;  %1948 = vmatpush.bf16.msrb.mxu2 %v2780_v28  ;;  %v3245_v7 = vld [vmem:[%s4599_s0 + $0x124] sm:$0xf] }
  0xff   : > { %1987 = vmatpush.bf16.msra.mxu1 %v2972_v63  ;;  %v2908_v15 = vor.u32 %v3245_v7, %v2905_v9  ;;  %v3275_v7 = vld [vmem:[%s4557_s13 + $0x10] sm:$0xff]  ;;  %v3274_v9 = vld [vmem:[%s4557_s13 + $0x8] sm:$0xff] }
 0x101   : > { %1974 = vmatpush.bf16.msra.mxu0 %v2908_v15  ;;  %v3283_v15 = vld [vmem:[%s4557_s13 + $0x50] sm:$0xff] }
 0x102   : > { %1962 = vmatpush.bf16.msrb.mxu3 %v2836_v23  ;;  %1949 = vmatpush.bf16.msrb.mxu2 %v2772_v42 }
 0x103   : > { %1988 = vmatpush.bf16.msra.mxu1 %v2964_v8  ;;  %v3287_v8 = vld [vmem:[%s4557_s13 + $0x70] sm:$0xff] }
 0x105   : > { %1975 = vmatpush.bf16.msra.mxu0 %v2900_v27 }
 0x106   : > { %1963 = vmatpush.bf16.msrb.mxu3 %v2828_v36  ;;  %1950 = vmatpush.bf16.msrb.mxu2 %v2764_v53 }
 0x107   : > { %1989 = vmatpush.bf16.msra.mxu1 %v2956_v22 }
 0x109   : > { %1976 = vmatpush.bf16.msra.mxu0 %v2892_v37 }
 0x145   : > { %v1396_v55 = vpop.f32.mrf.mxu0 }
 0x146   : > { %v1397_v59 = vadd.f32 %v1396_v55, %v1034_v47  ;;  %v1409_v60 = vpop.f32.mrf.mxu1  ;;  %v3280_v47 = vld [vmem:[%s4557_s13 + $0x38] sm:$0xff] }
 0x148   : > { %v1410_v3 = vadd.f32 %v1409_v60, %v1397_v59 }
 0x14a   : > { %v1466_v10 = vmax.f32 %v1410_v3, 0.0 }
 0x14b   : > { %v1370_v14 = vpop.f32.mrf.mxu2 }
 0x14c   : > { %v1480_v16 = vmul.f32 %v1472_v61, %v1466_v10  ;;  %v1371_v17 = vadd.f32 %v1370_v14, %v1033_v62  ;;  %v1383_v18 = vpop.f32.mrf.mxu3  ;;  %v1487_v61 = vperm.slane %v4366_v0, 2  ;;  %v3278_v0 = vld [vmem:[%s4557_s13 + $0x28] sm:$0xff] }
 0x14d   : > { %v1398_v21 = vpop.f32.mrf.mxu0  ;;  %v3286_v10 = vld [vmem:[%s4557_s13 + $0x68] sm:$0xff] }
 0x14e   : > { %v1494_v23 = vadd.f32 %v1486_v11, %v1480_v16  ;;  %v1384_v24 = vadd.f32 %v1383_v18, %v1371_v17  ;;  %v1411_v26 = vpop.f32.mrf.mxu1  ;;  %v3273_v11 = vld [vmem:[%s4557_s13] sm:$0xff]  ;;  %v3282_v17 = vld [vmem:[%s4557_s13 + $0x48] sm:$0xff] }
 0x14f   : > { %v1565_v16 = vld [vmem:[%s4603_s3] sm:$0x3] }
 0x150   : > { %v1498_v28 = vpack.c.bf16 %v1494_v23, %v1494_v23  ;;  %v1465_v29 = vmax.f32 %v1384_v24, 0.0  ;;  %v1567_v19 = vperm.slane %v1565_v16, 0  ;;  %v3281_v21 = vld [vmem:[%s4557_s13 + $0x40] sm:$0xff]  ;;  %v3296_v24 = vld [vmem:[%s4561_s17 + $0x38] sm:$0xff] }
 0x152   : > { %v1479_v31 = vmul.f32 %v1471_v25, %v1465_v29  ;;  %1912 = vmatmul.bf16.vlgmr.msra.gmra.mxu3 %v1498_v28 }
 0x153   : > { %v1372_v36 = vpop.f32.mrf.mxu2  ;;  %2160 = vmatpush.bf16.msra.mxu3 %v3288_v6  ;;  %v3309_v6 = vld [vmem:[%s4558_s14] ss:$0 sm:$0xff] }
 0x154   : > { %v1493_v38 = vadd.f32 %v1485_v30, %v1479_v31  ;;  %v1385_v39 = vpop.f32.mrf.mxu3  ;;  %v2005_v31 = vld [vmem:[%s4556_s12] sm:$0x3] }
 0x155   : > { %v1448_v40 = vpop.f32.mrf.mxu0  ;;  %v2007_v37 = vperm.slane %v2005_v31, 0 }
 0x156   : > { %v1497_v41 = vpack.c.bf16 %v1493_v38, %v1493_v38  ;;  %v1449_v42 = vadd.f32 %v1448_v40, %v1036_v32  ;;  %v1461_v43 = vpop.f32.mrf.mxu1  ;;  %v1568_v40 = vperm.slane %v1565_v16, 1 }
 0x157   : > { %2161 = vmatpush.bf16.msra.mxu3 %v3287_v8 }
 0x158   : > { %v1462_v44 = vadd.f32 %v1461_v43, %v1449_v42  ;;  %1899 = vmatmul.bf16.vlgmr.msra.gmra.mxu2 %v1497_v41 }
 0x159   : > { %2147 = vmatpush.bf16.msra.mxu2 %v3280_v47 }
 0x15a   : > { %v1468_v49 = vmax.f32 %v1462_v44, 0.0 }
 0x15b   : > { %v1422_v51 = vpop.f32.mrf.mxu2  ;;  %2162 = vmatpush.bf16.msra.mxu3 %v3286_v10  ;;  %v3310_v10 = vld [vmem:[%s4559_s15] ss:$0 sm:$0xff] }
 0x15c   : > { %v1482_v52 = vmul.f32 %v1474_v45, %v1468_v49  ;;  %v1423_v53 = vadd.f32 %v1422_v51, %v1035_v46  ;;  %v1435_v54 = vpop.f32.mrf.mxu3 }
 0x15d   : > { %v1450_v55 = vpop.f32.mrf.mxu0  ;;  %2148 = vmatpush.bf16.msra.mxu2 %v3279_v48  ;;  %v3300_v48 = vld [vmem:[%s4565_s21 + $0x18] sm:$0xff] }
 0x15e   : > { %v1496_v56 = vadd.f32 %v1488_v50, %v1482_v52  ;;  %v1436_v57 = vadd.f32 %v1435_v54, %v1423_v53  ;;  %v1463_v59 = vpop.f32.mrf.mxu1 }
 0x15f   : > { %2163 = vmatpush.bf16.msra.mxu3 %v3285_v12  ;;  %v3311_v12 = vld [vmem:[%s4560_s16] ss:$0 sm:$0xff] }
 0x160   : > { %v1500_v60 = vpack.c.bf16 %v1496_v56, %v1496_v56  ;;  %v1467_v35 = vmax.f32 %v1436_v57, 0.0  ;;  %v2008_v56 = vperm.slane %v2005_v31, 1 }
 0x161   : > { %2149 = vmatpush.bf16.msra.mxu2 %v3278_v0  ;;  %v3299_v0 = vld [vmem:[%s4565_s21 + $0x10] sm:$0xff] }
 0x162   : > { %v1481_v62 = vmul.f32 %v1473_v58, %v1467_v35  ;;  %1938 = vmatmul.bf16.vlgmr.msrb.gmra.mxu1 %v1500_v60  ;;  %1964 = vmatmul.bf16.vlgmr.msrb.gmra.mxu3 %v1498_v28  ;;  %v1997_v28 = vld [vmem:[%s4604_s1] sm:$0x3]  ;;  %v3295_v35 = vld [vmem:[%s4561_s17 + $0x30] sm:$0xff] }
 0x163   : > { %v1424_v63 = vpop.f32.mrf.mxu2  ;;  %2164 = vmatpush.bf16.msra.mxu3 %v3284_v13  ;;  %v1999_v34 = vperm.slane %v1997_v28, 0  ;;  %v2000_v54 = vperm.slane %v1997_v28, 1  ;;  %2322 = vmatpush.bf16.msrb.mxu1 %v3300_v48 }
 0x164   : > { %v1495_v1 = vadd.f32 %v1487_v61, %v1481_v62  ;;  %v1437_v2 = vpop.f32.mrf.mxu3  ;;  %v3294_v61 = vld [vmem:[%s4561_s17 + $0x28] sm:$0xff]  ;;  %v3293_v62 = vld [vmem:[%s4561_s17 + $0x20] sm:$0xff]  ;;  %v3292_v63 = vld [vmem:[%s4561_s17 + $0x18] sm:$0xff] }
 0x165   : > { %2150 = vmatpush.bf16.msra.mxu2 %v3277_v4  ;;  %v3290_v2 = vld [vmem:[%s4561_s17 + $0x8] sm:$0xff] }
 0x166   : > { %v1499_v3 = vpack.c.bf16 %v1495_v1, %v1495_v1  ;;  %v3291_v1 = vld [vmem:[%s4561_s17 + $0x10] sm:$0xff] }
 0x167   : > { %2165 = vmatpush.bf16.msra.mxu3 %v3283_v15  ;;  %2323 = vmatpush.bf16.msrb.mxu1 %v3299_v0 }
 0x168   : > { %1925 = vmatmul.bf16.vlgmr.msrb.gmra.mxu0 %v1499_v3  ;;  %1951 = vmatmul.bf16.vlgmr.msrb.gmra.mxu2 %v1497_v41 }
 0x169   : > { %2151 = vmatpush.bf16.msra.mxu2 %v3276_v5  ;;  %2253 = vmatpush.bf16.msrb.mxu0 %v3296_v24  ;;  %v3314_v24 = vld [vmem:[%s4564_s20] ss:$0 sm:$0xff] }
 0x16b   : > { %2166 = vmatpush.bf16.msra.mxu3 %v3282_v17  ;;  %v3298_v17 = vld [vmem:[%s4565_s21 + $0x8] sm:$0xff] }
 0x16c   : > { %2324 = vmatpush.bf16.msrb.mxu1 %v3298_v17 }
 0x16d   : > { %2152 = vmatpush.bf16.msra.mxu2 %v3275_v7  ;;  %2254 = vmatpush.bf16.msrb.mxu0 %v3295_v35 }
 0x16f   : > { %2167 = vmatpush.bf16.msra.mxu3 %v3281_v21 }
 0x171   : > { %2153 = vmatpush.bf16.msra.mxu2 %v3274_v9  ;;  %2255 = vmatpush.bf16.msrb.mxu0 %v3294_v61 }
 0x172   : > { %1990 = vmatmul.bf16.vlgmr.msra.gmra.mxu1 %v1500_v60 }
 0x175   : > { %2154 = vmatpush.bf16.msra.mxu2 %v3273_v11  ;;  %2256 = vmatpush.bf16.msrb.mxu0 %v3293_v62 }
 0x178   : > { %1977 = vmatmul.bf16.vlgmr.msra.gmra.mxu0 %v1499_v3  ;;  %v3289_v3 = vld [vmem:[%s4561_s17] sm:$0xff] }
 0x179   : > { %2257 = vmatpush.bf16.msrb.mxu0 %v3292_v63 }
 0x17d   : > { %2258 = vmatpush.bf16.msrb.mxu0 %v3291_v1 }
 0x181   : > { %2259 = vmatpush.bf16.msrb.mxu0 %v3290_v2 }
 0x185   : > { %2260 = vmatpush.bf16.msrb.mxu0 %v3289_v3 }
 0x1d5   : > { %v1913_v14 = vpop.f32.mrf.mxu3 }
 0x1db   : > { %v1900_v18 = vpop.f32.mrf.mxu2 }
 0x1dc   : > { %v1901_v23 = vadd.f32 %v1900_v18, %v1567_v19  ;;  %v3297_v18 = vld [vmem:[%s4565_s21] sm:$0xff] }
 0x1dd   : > { %v1915_v20 = vpop.f32.mrf.mxu3  ;;  %2325 = vmatpush.bf16.msrb.mxu1 %v3297_v18  ;;  %v3312_v19 = vld [vmem:[%s4562_s18] ss:$0 sm:$0xff] }
 0x1de   : > { %v1914_v26 = vadd.f32 %v1913_v14, %v1901_v23 }
 0x1df   : > { %v1939_v22 = vpop.f32.mrf.mxu1 }
 0x1e3   : > { %v1902_v25 = vpop.f32.mrf.mxu2 }
 0x1e5   : > { %v1926_v27 = vpop.f32.mrf.mxu0  ;;  %v1965_v29 = vpop.f32.mrf.mxu3 }
 0x1e6   : > { %v1927_v30 = vadd.f32 %v1926_v27, %v1914_v26 }
 0x1e7   : > { %v1941_v32 = vpop.f32.mrf.mxu1 }
 0x1e8   : > { %v1940_v33 = vadd.f32 %v1939_v22, %v1927_v30  ;;  %v3313_v22 = vld [vmem:[%s4563_s19] ss:$0 sm:$0xff] }
 0x1e9   : > { %v3316_v32 = vld [vmem:[%s4567_s23] ss:$0 sm:$0xff] }
 0x1ea   : > { %v1995_v36 = vmax.f32 %v1940_v33, 0.0 }
 0x1eb   : > { %v1952_v38 = vpop.f32.mrf.mxu2 }
 0x1ec   : > { %v2003_v39 = vmul.f32 %v1999_v34, %v1995_v36  ;;  %v1953_v45 = vadd.f32 %v1952_v38, %v1568_v40  ;;  %v3317_v34 = vld [vmem:[%s4568_s24] ss:$0 sm:$0xff] }
 0x1ed   : > { %v1928_v41 = vpop.f32.mrf.mxu0  ;;  %v1967_v42 = vpop.f32.mrf.mxu3 }
 0x1ee   : > { %v2011_v43 = vadd.f32 %v2007_v37, %v2003_v39  ;;  %v1966_v49 = vadd.f32 %v1965_v29, %v1953_v45  ;;  %v3315_v29 = vld [vmem:[%s4566_s22] ss:$0 sm:$0xff] }
 0x1ef   : > { %v1991_v44 = vpop.f32.mrf.mxu1  ;;  %v3318_v37 = vld [vmem:[%s4569_s25] ss:$0 sm:$0xff] }
 0x1f0   : > { %v2013_v46 = vpack.c.bf16 %v2011_v43, %v2011_v43  ;;  %v3319_v42 = vld [vmem:[#allocation2] ss:$0 sm:$0xff] }
 0x1f2   : > { %2155 = vmatmul.bf16.vlgmr.msra.gmra.mxu2 %v2013_v46 }
 0x1f3   : > { %v1954_v47 = vpop.f32.mrf.mxu2 }
 0x1f5   : > { %v1978_v50 = vpop.f32.mrf.mxu0 }
 0x1f6   : > { %v1979_v51 = vadd.f32 %v1978_v50, %v1966_v49 }
 0x1f7   : > { %v1993_v52 = vpop.f32.mrf.mxu1 }
 0x1f8   : > { %v1992_v53 = vadd.f32 %v1991_v44, %v1979_v51 }
 0x1fa   : > { %v1996_v55 = vmax.f32 %v1992_v53, 0.0 }
 0x1fc   : > { %v2004_v57 = vmul.f32 %v2000_v54, %v1996_v55 }
 0x1fd   : > { %v1980_v58 = vpop.f32.mrf.mxu0 }
 0x1fe   : > { %v2012_v59 = vadd.f32 %v2008_v56, %v2004_v57 }
 0x200   : > { %v2014_v60 = vpack.c.bf16 %v2012_v59, %v2012_v59 }
 0x202   : > { %2168 = vmatmul.bf16.vlgmr.msra.gmra.mxu3 %v2014_v60 }
 0x275   : > { %v2156_v4 = vpop.f32.mrf.mxu2 }
 0x276   : > { %v2157_v7 = vadd.f32 %v3309_v6, %v2156_v4 }
 0x27d   : > { %v2158_v5 = vpop.f32.mrf.mxu2 }
 0x285   : > { %v2169_v8 = vpop.f32.mrf.mxu3 }
 0x286   : > { %v2170_v9 = vadd.f32 %v2169_v8, %v2157_v7 }
 0x288   : > { %v2173_v11 = vmax.f32 %v2170_v9, 0.0 }
 0x28a   : > { %v2178_v13 = vmul.f32 %v3310_v10, %v2173_v11 }
 0x28c   : > { %v2183_v14 = vadd.f32 %v3311_v12, %v2178_v13 }
 0x28d   : > { %v2171_v15 = vpop.f32.mrf.mxu3 }
 0x28e   : > { %v2184_v16 = vpack.c.bf16 %v2183_v14, %v2183_v14 }
 0x290   : > { %2261 = vmatmul.bf16.vlgmr.msrb.gmra.mxu0 %v2184_v16 }
 0x30d   : > { %v2262_v20 = vpop.f32.mrf.mxu0 }
 0x30e   : > { %v2263_v21 = vadd.f32 %v3312_v19, %v2262_v20 }
 0x310   : > { %v2266_v23 = vmax.f32 %v2263_v21, 0.0 }
 0x312   : > { %v2271_v25 = vmul.f32 %v3313_v22, %v2266_v23 }
 0x314   : > { %v2276_v26 = vadd.f32 %v3314_v24, %v2271_v25 }
 0x315   : > { %v2264_v27 = vpop.f32.mrf.mxu0 }
 0x316   : > { %v2277_v28 = vpack.c.bf16 %v2276_v26, %v2276_v26 }
 0x318   : > { %3125 = vmatmul.msk.bf16.vlgmr.msrb.gmra.mxu1 %vm2314_vm0, %v2277_v28 }
 0x395   : > { %v2327_v30 = vpop.f32.mrf.mxu1 }
 0x396   : > { %v2328_v31 = vadd.f32 %v3315_v29, %v2327_v30 }
 0x398   : > { %v2331_v33 = vmax.f32 %v2328_v31, 0.0 }
 0x39a   : > { %v2336_v36 = vmul.f32 %v3316_v32, %v2331_v33 }
 0x39c   : > { %v2341_v38 = vadd.f32 %v3317_v34, %v2336_v36 }
 0x39d   : > { %v2329_v39 = vpop.f32.mrf.mxu1 }
 0x39e   : > { %v2346_v40 = vmul.f32 %v3318_v37, %v2341_v38 }
 0x3a0   : > { %v2348_v41 = vsel %vm2347_vm1, %v2346_v40, 0.0 }
 0x3a1   : > { %2349 = vadd.xlane.f32.xlu0 %v2348_v41 }
 0x414   : > { %v2350_v43 = vpop.xlane.xlu0 %2349 }
 0x415   : > { %v2355_v44 = vadd.f32 %v3319_v42, %v2350_v43 }
 0x417   : > { %v3126_v45 = vmul.f32 -1.442695, %v2355_v44 }
 0x419   : > { %3320 = vpow2.f32 %v3126_v45 }
 0x41f   : > { %v3321_v46 = vpop.eup %3320 }
 0x420   : > { %v2359_v47 = vadd.f32 1.0, %v3321_v46 }
 0x422   : > { %3322 = vrcp.f32 %v2359_v47  ;;  %v2371_v52 = vand.u32 2147483648, %v2359_v47  ;;  %v2369_v54 = vand.u32 2147483647, %v2359_v47  ;;  %vm2365_vm3 = vweird.f32 %v2359_v47 }
 0x424   : > { %v2372_v56 = vor.u32 1.1754944e-38, %v2371_v52  ;;  %vm2370_vm6 = vcmp.eq.f32.partialorder %v2369_v54, 8.507059e+37 }
 0x428   : > { %v3323_v49 = vpop.eup %3322 }
 0x429   : > { %v2361_v50 = vmul.f32 %v3323_v49, %v2359_v47  ;;  %vm2366_vm2 = vweird.f32 %v3323_v49 }
 0x42a   : > { %vm2367_vm4 = vmor %vm2365_vm3, %vm2366_vm2 }
 0x42b   : > { %v2362_v51 = vsub.f32 1.0, %v2361_v50 }
 0x42d   : > { %v2363_v53 = vmul.f32 %v3323_v49, %v2362_v51 }
 0x42f   : > { %v2364_v55 = vadd.f32 %v3323_v49, %v2363_v53 }
 0x431   : > { %v2368_v57 = vsel %vm2367_vm4, %v3323_v49, %v2364_v55 }
 0x432   : > { %v2373_v58 = vsel %vm2370_vm6, %v2372_v56, %v2368_v57 }
 0x433   : > { %2376 = vst.msk [vmem:[%s815_s10] sm:$0xff] %vm2375_vm5, %v2373_v58 }
 0x434 PF: > { %s4607_s29 = sld [smem:[#allocation3_spill]] }
 0x43a   : > { %s39_s8 = sadd.s32 1, %s4607_s29  }
 0x43b   : > { %p36_p4 = scmp.ge.s32.totalorder %s39_s8, 5  }
 0x43d   :  { %38 = sbr.rel (!%p36_p4) target bundleno = 14 (0xe), region = 158 }

</bundles_post_ra>
